<compile_context>
chip_gen: v7x
topology: tpu7x:2x2x1
jax: 0.10.0
libtpu: 0.0.40
codegen_flags: <defaults>
</compile_context>

<pallas_src>
import functools

import jax
import jax.numpy as jnp
import numpy as np
from jax.experimental import pallas as pl
from jax.experimental.pallas import tpu as pltpu


# ---------------------------------------------------------------------------
# Pallas kernel: conv3x3 (9 shifted matmuls) + bias + ReLU + streamed global
# average pool + fused (fc | head) matmul, over a (batch_tile, H_chunk) grid.
# ---------------------------------------------------------------------------
def _fused_kernel(x_ref, wc_ref, bc_ref, wf_ref, bf_ref, out_ref, feat_acc, *, th):
    tb, _, wp2, cin_p = x_ref.shape          # (tb, H+2, W+2, cin_p)
    w = wp2 - 2
    cmid_p = wc_ref.shape[2]
    h_idx = pl.program_id(1)

    @pl.when(h_idx == 0)
    def _init():
        feat_acc[...] = jnp.zeros_like(feat_acc)

    r = pl.multiple_of(h_idx * th, th)       # first output row of this chunk
    m2 = tb * th * w
    bias = bc_ref[...]                       # (1, cmid_p) -- hoisted, added once

    # conv for this row chunk: sum of 9 shifted matmuls on the MXU.
    acc = jnp.zeros((m2, cmid_p), jnp.float32)
    for tap in range(9):
        dh, dw = tap // 3, tap % 3
        xs = x_ref[:, pl.ds(r + dh, th), dw:dw + w, :]      # (tb, th, w, cin_p)
        acc = acc + jnp.dot(xs.reshape(m2, cin_p), wc_ref[tap],
                            preferred_element_type=jnp.float32)

    act = jnp.maximum(acc + bias, 0.0)                      # bias + ReLU
    # streamed partial sum of the global average pool (1/(H*W) folded into wf)
    feat_acc[...] += jnp.sum(act.reshape(tb, th * w, cmid_p), axis=1)

    @pl.when(h_idx == pl.num_programs(1) - 1)
    def _finalize():
        out_ref[...] = (
            jnp.dot(feat_acc[...], wf_ref[...], preferred_element_type=jnp.float32)
            + bf_ref[...]
        )


def _round_up(x, m):
    return ((x + m - 1) // m) * m


# ---------------------------------------------------------------------------
# Wrapper: layout/padding plumbing (one-time, O(input)) + pallas_call.
# ---------------------------------------------------------------------------
@functools.partial(jax.jit, static_argnames=("is_feat",))
def new_model_forward(x, params, is_feat=True):
    """x: (B, C_in, H, W) float32 NCHW. Returns (logits, head) if is_feat."""
    conv_w, conv_b, fc_w, fc_b, head_w, head_b = params
    B, C_in, H, W = x.shape
    C_mid = conv_w.shape[0]
    num_classes = fc_w.shape[0]

    cin_p = _round_up(C_in, 8)
    cmid_p = _round_up(C_mid, 128)
    nout = num_classes + 1                       # logits || head, fused
    nout_p = _round_up(nout, 128)

    # tile sizes (small enough for v7x's 64 MiB VMEM at realistic shapes)
    if B <= 8:
        tb = B
    else:
        assert B % 8 == 0, "batch must be a multiple of 8 when > 8"
        tb = 8
    th = 8 if H % 8 == 0 else H

    # activations: NCHW -> NHWC, 1-px spatial zero pad, channel pad to cin_p
    x_nhwc = jnp.transpose(x, (0, 2, 3, 1))
    x_pad = jnp.pad(
        x_nhwc, ((0, 0), (1, 1), (1, 1), (0, cin_p - C_in))
    ).astype(jnp.float32)

    # conv weight (O, I, kh, kw) -> (kh, kw, I, O), zero-padded, as 9 taps
    wc = jnp.transpose(conv_w, (2, 3, 1, 0))
    wc = jnp.pad(wc, ((0, 0), (0, 0), (0, cin_p - C_in), (0, cmid_p - C_mid)))
    wc = wc.reshape(9, cin_p, cmid_p).astype(jnp.float32)
    bc = jnp.pad(conv_b, (0, cmid_p - C_mid)).reshape(1, cmid_p).astype(jnp.float32)

    # fused (fc | head) weight, lane-padded to 128 outputs; fold 1/(H*W) pooling
    wf = jnp.zeros((cmid_p, nout_p), jnp.float32)
    wf = wf.at[:C_mid, :num_classes].set(fc_w.T.astype(jnp.float32))
    wf = wf.at[:C_mid, num_classes].set(head_w[0].astype(jnp.float32))
    wf = wf * (1.0 / float(H * W))
    bf = jnp.zeros((1, nout_p), jnp.float32)
    bf = bf.at[0, :num_classes].set(fc_b.astype(jnp.float32))
    bf = bf.at[0, num_classes].set(head_b[0].astype(jnp.float32))

    grid = (B // tb, H // th)
    kernel = functools.partial(_fused_kernel, th=th)

    out = pl.pallas_call(
        kernel,
        out_shape=jax.ShapeDtypeStruct((B, nout_p), jnp.float32),
        grid_spec=pltpu.PrefetchScalarGridSpec(
            num_scalar_prefetch=0,
            grid=grid,
            in_specs=[
                pl.BlockSpec((tb, H + 2, W + 2, cin_p), lambda b, h: (b, 0, 0, 0)),
                pl.BlockSpec((9, cin_p, cmid_p), lambda b, h: (0, 0, 0)),
                pl.BlockSpec((1, cmid_p), lambda b, h: (0, 0)),
                pl.BlockSpec((cmid_p, nout_p), lambda b, h: (0, 0)),
                pl.BlockSpec((1, nout_p), lambda b, h: (0, 0)),
            ],
            out_specs=pl.BlockSpec((tb, nout_p), lambda b, h: (b, 0)),
            scratch_shapes=[pltpu.VMEM((tb, cmid_p), jnp.float32)],
        ),
        compiler_params=pltpu.CompilerParams(
            dimension_semantics=("parallel", "arbitrary"),
            vmem_limit_bytes=32 * 1024 * 1024,
        ),
    )(x_pad, wc, bc, wf, bf)

    logits = out[:, :num_classes]
    head = out[:, num_classes:num_classes + 1]
    if is_feat:
        return logits, head
    return logits


# ---------------------------------------------------------------------------
# Deterministic parameter construction (PyTorch-style layouts).
# ---------------------------------------------------------------------------
def make_params(key, c_in, c_mid, num_classes):
    ks = jax.random.split(key, 6)
    conv_w = 0.1 * jax.random.normal(ks[0], (c_mid, c_in, 3, 3), jnp.float32)
    conv_b = 0.1 * jax.random.normal(ks[1], (c_mid,), jnp.float32)
    fc_w = 0.1 * jax.random.normal(ks[2], (num_classes, c_mid), jnp.float32)
    fc_b = 0.1 * jax.random.normal(ks[3], (num_classes,), jnp.float32)
    head_w = 0.1 * jax.random.normal(ks[4], (1, c_mid), jnp.float32)   # self.head
    head_b = 0.1 * jax.random.normal(ks[5], (1,), jnp.float32)
    return (conv_w, conv_b, fc_w, fc_b, head_w, head_b)


# Pure-JAX reference for correctness checking.
def reference_forward(x, params):
    conv_w, conv_b, fc_w, fc_b, head_w, head_b = params
    y = jax.lax.conv_general_dilated(
        x, conv_w, window_strides=(1, 1), padding=((1, 1), (1, 1)),
        dimension_numbers=("NCHW", "OIHW", "NCHW"))
    y = jnp.maximum(y + conv_b[None, :, None, None], 0.0)
    feat = jnp.mean(y, axis=(2, 3))                    # (B, C_mid)
    logits = feat @ fc_w.T + fc_b
    head = feat @ head_w.T + head_b
    return logits, head


if __name__ == "__main__":
    B, C_in, H, W = 2, 4, 16, 16
    C_mid, num_classes = 8, 10

    key = jax.random.PRNGKey(0)
    kx, kp = jax.random.split(key)
    x = jax.random.normal(kx, (B, C_in, H, W), jnp.float32)
    params = make_params(kp, C_in, C_mid, num_classes)

    logits, head_out = new_model_forward(x, params, is_feat=True)
    jax.block_until_ready((logits, head_out))

    ref_logits, ref_head = reference_forward(x, params)
    assert logits.shape == (B, num_classes) and head_out.shape == (B, 1)
    np.testing.assert_allclose(np.asarray(logits), np.asarray(ref_logits),
                               rtol=1e-4, atol=1e-4)
    np.testing.assert_allclose(np.asarray(head_out), np.asarray(ref_head),
                               rtol=1e-4, atol=1e-4)

    print("KERNEL_OK")
</pallas_src>

<mosaic_0001>
module attributes {stable_mosaic.version = 11 : i64} {
  func.func @_fused_kernel(%arg0: i32, %arg1: i32, %arg2: memref<2x18x18x8xf32, #tpu.memory_space<vmem>>, %arg3: memref<9x8x128xf32, #tpu.memory_space<vmem>>, %arg4: memref<1x128xf32, #tpu.memory_space<vmem>>, %arg5: memref<128x128xf32, #tpu.memory_space<vmem>>, %arg6: memref<1x128xf32, #tpu.memory_space<vmem>>, %arg7: memref<2x128xf32, #tpu.memory_space<vmem>>, %arg8: memref<2x128xf32, #tpu.memory_space<vmem>>) attributes {dimension_semantics = [#tpu.dimension_semantics<parallel>, #tpu.dimension_semantics<arbitrary>], iteration_bounds = array<i64: 1, 2>, scalar_prefetch = 0 : i64, scratch_operands = 1 : i64, tpu.core_type = #tpu.core_type<tc>, window_params = [{transform_indices = @transform_0, window_bounds = array<i64: 2, 18, 18, 8>}, {pipeline_mode = #tpu.pipeline_mode<synchronous>, transform_indices = @transform_1, window_bounds = array<i64: 9, 8, 128>}, {pipeline_mode = #tpu.pipeline_mode<synchronous>, transform_indices = @transform_2, window_bounds = array<i64: 1, 128>}, {pipeline_mode = #tpu.pipeline_mode<synchronous>, transform_indices = @transform_3, window_bounds = array<i64: 128, 128>}, {pipeline_mode = #tpu.pipeline_mode<synchronous>, transform_indices = @transform_4, window_bounds = array<i64: 1, 128>}, {transform_indices = @transform_5, window_bounds = array<i64: 2, 128>}]} {
    %c0_i32 = arith.constant 0 : i32
    %0 = arith.cmpi eq, %arg1, %c0_i32 : i32
    %1 = arith.extui %0 : i1 to i32
    %c0_i32_0 = arith.constant 0 : i32
    %2 = arith.cmpi ne, %1, %c0_i32_0 : i32
    scf.if %2 {
      %cst_72 = arith.constant 0.000000e+00 : f32
      %91 = vector.broadcast %cst_72 : f32 to vector<2x128xf32>
      %c0_73 = arith.constant 0 : index
      %c0_74 = arith.constant 0 : index
      %92 = vector.load %arg8[%c0_73, %c0_74] : memref<2x128xf32, #tpu.memory_space<vmem>>, vector<2x128xf32>
      tpu.vector_store %arg8[%c0_73, %c0_74], %91 {strides = array<i32>} : memref<2x128xf32, #tpu.memory_space<vmem>>, vector<2x128xf32>,
    } else {
    }
    %c8_i32 = arith.constant 8 : i32
    %3 = arith.muli %arg1, %c8_i32 : i32
    %4 = tpu.assume_multiple %3, 8 : i32
    %c0 = arith.constant 0 : index
    %c0_1 = arith.constant 0 : index
    %5 = vector.load %arg4[%c0, %c0_1] : memref<1x128xf32, #tpu.memory_space<vmem>>, vector<1x128xf32>
    %cst = arith.constant 0.000000e+00 : f32
    %6 = vector.broadcast %cst : f32 to vector<256x128xf32>
    %c0_i32_2 = arith.constant 0 : i32
    %7 = arith.addi %4, %c0_i32_2 : i32
    %c0_3 = arith.constant 0 : index
    %8 = arith.index_cast %7 : i32 to index
    %c0_4 = arith.constant 0 : index
    %c0_5 = arith.constant 0 : index
    %9 = vector.load %arg2[%c0_3, %8, %c0_4, %c0_5] : memref<2x18x18x8xf32, #tpu.memory_space<vmem>>, vector<2x8x16x8xf32>
    %10 = vector.shape_cast %9 : vector<2x8x16x8xf32> to vector<256x8xf32>
    %c0_6 = arith.constant 0 : index
    %c0_7 = arith.constant 0 : index
    %c0_8 = arith.constant 0 : index
    %11 = vector.load %arg3[%c0_6, %c0_7, %c0_8] : memref<9x8x128xf32, #tpu.memory_space<vmem>>, vector<1x8x128xf32>
    %12 = vector.shape_cast %11 : vector<1x8x128xf32> to vector<8x128xf32>
    %cst_9 = arith.constant dense<0.000000e+00> : vector<256x128xf32>
    %13 = tpu.matmul %10, %12, %cst_9 {dimension_numbers = #tpu.dot_dimension_numbers<[1], [0], [0], [1], [0, 0, 1, 1], [], []>} : vector<256x8xf32>, vector<8x128xf32>, vector<256x128xf32> -> vector<256x128xf32>
    %14 = arith.addf %6, %13 : vector<256x128xf32>
    %c0_i32_10 = arith.constant 0 : i32
    %15 = arith.addi %4, %c0_i32_10 : i32
    %c0_11 = arith.constant 0 : index
    %16 = arith.index_cast %15 : i32 to index
    %c1 = arith.constant 1 : index
    %c0_12 = arith.constant 0 : index
    %17 = vector.load %arg2[%c0_11, %16, %c1, %c0_12] : memref<2x18x18x8xf32, #tpu.memory_space<vmem>>, vector<2x8x16x8xf32>
    %18 = vector.shape_cast %17 : vector<2x8x16x8xf32> to vector<256x8xf32>
    %c1_13 = arith.constant 1 : index
    %c0_14 = arith.constant 0 : index
    %c0_15 = arith.constant 0 : index
    %19 = vector.load %arg3[%c1_13, %c0_14, %c0_15] : memref<9x8x128xf32, #tpu.memory_space<vmem>>, vector<1x8x128xf32>
    %20 = vector.shape_cast %19 : vector<1x8x128xf32> to vector<8x128xf32>
    %cst_16 = arith.constant dense<0.000000e+00> : vector<256x128xf32>
    %21 = tpu.matmul %18, %20, %cst_16 {dimension_numbers = #tpu.dot_dimension_numbers<[1], [0], [0], [1], [0, 0, 1, 1], [], []>} : vector<256x8xf32>, vector<8x128xf32>, vector<256x128xf32> -> vector<256x128xf32>
    %22 = arith.addf %14, %21 : vector<256x128xf32>
    %c0_i32_17 = arith.constant 0 : i32
    %23 = arith.addi %4, %c0_i32_17 : i32
    %c0_18 = arith.constant 0 : index
    %24 = arith.index_cast %23 : i32 to index
    %c2 = arith.constant 2 : index
    %c0_19 = arith.constant 0 : index
    %25 = vector.load %arg2[%c0_18, %24, %c2, %c0_19] : memref<2x18x18x8xf32, #tpu.memory_space<vmem>>, vector<2x8x16x8xf32>
    %26 = vector.shape_cast %25 : vector<2x8x16x8xf32> to vector<256x8xf32>
    %c2_20 = arith.constant 2 : index
    %c0_21 = arith.constant 0 : index
    %c0_22 = arith.constant 0 : index
    %27 = vector.load %arg3[%c2_20, %c0_21, %c0_22] : memref<9x8x128xf32, #tpu.memory_space<vmem>>, vector<1x8x128xf32>
    %28 = vector.shape_cast %27 : vector<1x8x128xf32> to vector<8x128xf32>
    %cst_23 = arith.constant dense<0.000000e+00> : vector<256x128xf32>
    %29 = tpu.matmul %26, %28, %cst_23 {dimension_numbers = #tpu.dot_dimension_numbers<[1], [0], [0], [1], [0, 0, 1, 1], [], []>} : vector<256x8xf32>, vector<8x128xf32>, vector<256x128xf32> -> vector<256x128xf32>
    %30 = arith.addf %22, %29 : vector<256x128xf32>
    %c1_i32 = arith.constant 1 : i32
    %31 = arith.addi %4, %c1_i32 : i32
    %c0_24 = arith.constant 0 : index
    %32 = arith.index_cast %31 : i32 to index
    %c0_25 = arith.constant 0 : index
    %c0_26 = arith.constant 0 : index
    %33 = vector.load %arg2[%c0_24, %32, %c0_25, %c0_26] : memref<2x18x18x8xf32, #tpu.memory_space<vmem>>, vector<2x8x16x8xf32>
    %34 = vector.shape_cast %33 : vector<2x8x16x8xf32> to vector<256x8xf32>
    %c3 = arith.constant 3 : index
    %c0_27 = arith.constant 0 : index
    %c0_28 = arith.constant 0 : index
    %35 = vector.load %arg3[%c3, %c0_27, %c0_28] : memref<9x8x128xf32, #tpu.memory_space<vmem>>, vector<1x8x128xf32>
    %36 = vector.shape_cast %35 : vector<1x8x128xf32> to vector<8x128xf32>
    %cst_29 = arith.constant dense<0.000000e+00> : vector<256x128xf32>
    %37 = tpu.matmul %34, %36, %cst_29 {dimension_numbers = #tpu.dot_dimension_numbers<[1], [0], [0], [1], [0, 0, 1, 1], [], []>} : vector<256x8xf32>, vector<8x128xf32>, vector<256x128xf32> -> vector<256x128xf32>
    %38 = arith.addf %30, %37 : vector<256x128xf32>
    %c1_i32_30 = arith.constant 1 : i32
    %39 = arith.addi %4, %c1_i32_30 : i32
    %c0_31 = arith.constant 0 : index
    %40 = arith.index_cast %39 : i32 to index
    %c1_32 = arith.constant 1 : index
    %c0_33 = arith.constant 0 : index
    %41 = vector.load %arg2[%c0_31, %40, %c1_32, %c0_33] : memref<2x18x18x8xf32, #tpu.memory_space<vmem>>, vector<2x8x16x8xf32>
    %42 = vector.shape_cast %41 : vector<2x8x16x8xf32> to vector<256x8xf32>
    %c4 = arith.constant 4 : index
    %c0_34 = arith.constant 0 : index
    %c0_35 = arith.constant 0 : index
    %43 = vector.load %arg3[%c4, %c0_34, %c0_35] : memref<9x8x128xf32, #tpu.memory_space<vmem>>, vector<1x8x128xf32>
    %44 = vector.shape_cast %43 : vector<1x8x128xf32> to vector<8x128xf32>
    %cst_36 = arith.constant dense<0.000000e+00> : vector<256x128xf32>
    %45 = tpu.matmul %42, %44, %cst_36 {dimension_numbers = #tpu.dot_dimension_numbers<[1], [0], [0], [1], [0, 0, 1, 1], [], []>} : vector<256x8xf32>, vector<8x128xf32>, vector<256x128xf32> -> vector<256x128xf32>
    %46 = arith.addf %38, %45 : vector<256x128xf32>
    %c1_i32_37 = arith.constant 1 : i32
    %47 = arith.addi %4, %c1_i32_37 : i32
    %c0_38 = arith.constant 0 : index
    %48 = arith.index_cast %47 : i32 to index
    %c2_39 = arith.constant 2 : index
    %c0_40 = arith.constant 0 : index
    %49 = vector.load %arg2[%c0_38, %48, %c2_39, %c0_40] : memref<2x18x18x8xf32, #tpu.memory_space<vmem>>, vector<2x8x16x8xf32>
    %50 = vector.shape_cast %49 : vector<2x8x16x8xf32> to vector<256x8xf32>
    %c5 = arith.constant 5 : index
    %c0_41 = arith.constant 0 : index
    %c0_42 = arith.constant 0 : index
    %51 = vector.load %arg3[%c5, %c0_41, %c0_42] : memref<9x8x128xf32, #tpu.memory_space<vmem>>, vector<1x8x128xf32>
    %52 = vector.shape_cast %51 : vector<1x8x128xf32> to vector<8x128xf32>
    %cst_43 = arith.constant dense<0.000000e+00> : vector<256x128xf32>
    %53 = tpu.matmul %50, %52, %cst_43 {dimension_numbers = #tpu.dot_dimension_numbers<[1], [0], [0], [1], [0, 0, 1, 1], [], []>} : vector<256x8xf32>, vector<8x128xf32>, vector<256x128xf32> -> vector<256x128xf32>
    %54 = arith.addf %46, %53 : vector<256x128xf32>
    %c2_i32 = arith.constant 2 : i32
    %55 = arith.addi %4, %c2_i32 : i32
    %c0_44 = arith.constant 0 : index
    %56 = arith.index_cast %55 : i32 to index
    %c0_45 = arith.constant 0 : index
    %c0_46 = arith.constant 0 : index
    %57 = vector.load %arg2[%c0_44, %56, %c0_45, %c0_46] : memref<2x18x18x8xf32, #tpu.memory_space<vmem>>, vector<2x8x16x8xf32>
    %58 = vector.shape_cast %57 : vector<2x8x16x8xf32> to vector<256x8xf32>
    %c6 = arith.constant 6 : index
    %c0_47 = arith.constant 0 : index
    %c0_48 = arith.constant 0 : index
    %59 = vector.load %arg3[%c6, %c0_47, %c0_48] : memref<9x8x128xf32, #tpu.memory_space<vmem>>, vector<1x8x128xf32>
    %60 = vector.shape_cast %59 : vector<1x8x128xf32> to vector<8x128xf32>
    %cst_49 = arith.constant dense<0.000000e+00> : vector<256x128xf32>
    %61 = tpu.matmul %58, %60, %cst_49 {dimension_numbers = #tpu.dot_dimension_numbers<[1], [0], [0], [1], [0, 0, 1, 1], [], []>} : vector<256x8xf32>, vector<8x128xf32>, vector<256x128xf32> -> vector<256x128xf32>
    %62 = arith.addf %54, %61 : vector<256x128xf32>
    %c2_i32_50 = arith.constant 2 : i32
    %63 = arith.addi %4, %c2_i32_50 : i32
    %c0_51 = arith.constant 0 : index
    %64 = arith.index_cast %63 : i32 to index
    %c1_52 = arith.constant 1 : index
    %c0_53 = arith.constant 0 : index
    %65 = vector.load %arg2[%c0_51, %64, %c1_52, %c0_53] : memref<2x18x18x8xf32, #tpu.memory_space<vmem>>, vector<2x8x16x8xf32>
    %66 = vector.shape_cast %65 : vector<2x8x16x8xf32> to vector<256x8xf32>
    %c7 = arith.constant 7 : index
    %c0_54 = arith.constant 0 : index
    %c0_55 = arith.constant 0 : index
    %67 = vector.load %arg3[%c7, %c0_54, %c0_55] : memref<9x8x128xf32, #tpu.memory_space<vmem>>, vector<1x8x128xf32>
    %68 = vector.shape_cast %67 : vector<1x8x128xf32> to vector<8x128xf32>
    %cst_56 = arith.constant dense<0.000000e+00> : vector<256x128xf32>
    %69 = tpu.matmul %66, %68, %cst_56 {dimension_numbers = #tpu.dot_dimension_numbers<[1], [0], [0], [1], [0, 0, 1, 1], [], []>} : vector<256x8xf32>, vector<8x128xf32>, vector<256x128xf32> -> vector<256x128xf32>
    %70 = arith.addf %62, %69 : vector<256x128xf32>
    %c2_i32_57 = arith.constant 2 : i32
    %71 = arith.addi %4, %c2_i32_57 : i32
    %c0_58 = arith.constant 0 : index
    %72 = arith.index_cast %71 : i32 to index
    %c2_59 = arith.constant 2 : index
    %c0_60 = arith.constant 0 : index
    %73 = vector.load %arg2[%c0_58, %72, %c2_59, %c0_60] : memref<2x18x18x8xf32, #tpu.memory_space<vmem>>, vector<2x8x16x8xf32>
    %74 = vector.shape_cast %73 : vector<2x8x16x8xf32> to vector<256x8xf32>
    %c8 = arith.constant 8 : index
    %c0_61 = arith.constant 0 : index
    %c0_62 = arith.constant 0 : index
    %75 = vector.load %arg3[%c8, %c0_61, %c0_62] : memref<9x8x128xf32, #tpu.memory_space<vmem>>, vector<1x8x128xf32>
    %76 = vector.shape_cast %75 : vector<1x8x128xf32> to vector<8x128xf32>
    %cst_63 = arith.constant dense<0.000000e+00> : vector<256x128xf32>
    %77 = tpu.matmul %74, %76, %cst_63 {dimension_numbers = #tpu.dot_dimension_numbers<[1], [0], [0], [1], [0, 0, 1, 1], [], []>} : vector<256x8xf32>, vector<8x128xf32>, vector<256x128xf32> -> vector<256x128xf32>
    %78 = arith.addf %70, %77 : vector<256x128xf32>
    %79 = vector.broadcast %5 : vector<1x128xf32> to vector<256x128xf32>
    %80 = arith.addf %78, %79 : vector<256x128xf32>
    %cst_64 = arith.constant 0.000000e+00 : f32
    %81 = vector.broadcast %cst_64 : f32 to vector<256x128xf32>
    %82 = arith.maximumf %80, %81 : vector<256x128xf32>
    %c0_65 = arith.constant 0 : index
    %c0_66 = arith.constant 0 : index
    %83 = vector.load %arg8[%c0_65, %c0_66] : memref<2x128xf32, #tpu.memory_space<vmem>>, vector<2x128xf32>
    %84 = vector.shape_cast %82 : vector<256x128xf32> to vector<2x128x128xf32>
    %cst_67 = arith.constant dense<0.000000e+00> : vector<2x128xf32>
    %85 = vector.multi_reduction <add>, %84, %cst_67 [1] : vector<2x128x128xf32> to vector<2x128xf32>
    %86 = arith.addf %83, %85 : vector<2x128xf32>
    %c0_68 = arith.constant 0 : index
    %c0_69 = arith.constant 0 : index
    %87 = vector.load %arg8[%c0_68, %c0_69] : memref<2x128xf32, #tpu.memory_space<vmem>>, vector<2x128xf32>
    tpu.vector_store %arg8[%c0_68, %c0_69], %86 {strides = array<i32>} : memref<2x128xf32, #tpu.memory_space<vmem>>, vector<2x128xf32>,
    %c1_i32_70 = arith.constant 1 : i32
    %88 = arith.cmpi eq, %arg1, %c1_i32_70 : i32
    %89 = arith.extui %88 : i1 to i32
    %c0_i32_71 = arith.constant 0 : i32
    %90 = arith.cmpi ne, %89, %c0_i32_71 : i32
    scf.if %90 {
      %c0_72 = arith.constant 0 : index
      %c0_73 = arith.constant 0 : index
      %91 = vector.load %arg8[%c0_72, %c0_73] : memref<2x128xf32, #tpu.memory_space<vmem>>, vector<2x128xf32>
      %c0_74 = arith.constant 0 : index
      %c0_75 = arith.constant 0 : index
      %92 = vector.load %arg5[%c0_74, %c0_75] : memref<128x128xf32, #tpu.memory_space<vmem>>, vector<128x128xf32>
      %cst_76 = arith.constant dense<0.000000e+00> : vector<2x128xf32>
      %93 = tpu.matmul %91, %92, %cst_76 {dimension_numbers = #tpu.dot_dimension_numbers<[1], [0], [0], [1], [0, 0, 1, 1], [], []>} : vector<2x128xf32>, vector<128x128xf32>, vector<2x128xf32> -> vector<2x128xf32>
      %c0_77 = arith.constant 0 : index
      %c0_78 = arith.constant 0 : index
      %94 = vector.load %arg6[%c0_77, %c0_78] : memref<1x128xf32, #tpu.memory_space<vmem>>, vector<1x128xf32>
      %95 = vector.broadcast %94 : vector<1x128xf32> to vector<2x128xf32>
      %96 = arith.addf %93, %95 : vector<2x128xf32>
      %c0_79 = arith.constant 0 : index
      %c0_80 = arith.constant 0 : index
      %97 = vector.load %arg7[%c0_79, %c0_80] : memref<2x128xf32, #tpu.memory_space<vmem>>, vector<2x128xf32>
      tpu.vector_store %arg7[%c0_79, %c0_80], %96 {strides = array<i32>} : memref<2x128xf32, #tpu.memory_space<vmem>>, vector<2x128xf32>,
    } else {
    }
    return
  }
  func.func @transform_0(%arg0: i32, %arg1: i32) -> (i32, i32, i32, i32) {
    %c0_i32 = arith.constant 0 : i32
    %c0_i32_0 = arith.constant 0 : i32
    %c0_i32_1 = arith.constant 0 : i32
    %c0_i32_2 = arith.constant 0 : i32
    return %arg0, %c0_i32, %c0_i32_0, %c0_i32_1 : i32, i32, i32, i32
  }
  func.func @transform_1(%arg0: i32, %arg1: i32) -> (i32, i32, i32) {
    %c0_i32 = arith.constant 0 : i32
    %c0_i32_0 = arith.constant 0 : i32
    %c0_i32_1 = arith.constant 0 : i32
    %c0_i32_2 = arith.constant 0 : i32
    return %c0_i32, %c0_i32_0, %c0_i32_1 : i32, i32, i32
  }
  func.func @transform_2(%arg0: i32, %arg1: i32) -> (i32, i32) {
    %c0_i32 = arith.constant 0 : i32
    %c0_i32_0 = arith.constant 0 : i32
    %c0_i32_1 = arith.constant 0 : i32
    return %c0_i32, %c0_i32_0 : i32, i32
  }
  func.func @transform_3(%arg0: i32, %arg1: i32) -> (i32, i32) {
    %c0_i32 = arith.constant 0 : i32
    %c0_i32_0 = arith.constant 0 : i32
    %c0_i32_1 = arith.constant 0 : i32
    return %c0_i32, %c0_i32_0 : i32, i32
  }
  func.func @transform_4(%arg0: i32, %arg1: i32) -> (i32, i32) {
    %c0_i32 = arith.constant 0 : i32
    %c0_i32_0 = arith.constant 0 : i32
    %c0_i32_1 = arith.constant 0 : i32
    return %c0_i32, %c0_i32_0 : i32, i32
  }
  func.func @transform_5(%arg0: i32, %arg1: i32) -> (i32, i32) {
    %c0_i32 = arith.constant 0 : i32
    %c0_i32_0 = arith.constant 0 : i32
    return %arg0, %c0_i32 : i32, i32
  }
}

</mosaic_0001>

<bundles_post_ra>
// kernel: new_model_forward.1
= control target key start
LH: loop header
LB: loop body
LE: loop exit
PB: predicated region body
PF: predicated region fallthrough
CT: control target
= control target key end

     0   :  { %s5637_s18 = smov 0   ;;  %s5639_s19 = smov 0   ;;  %s6683_s0 = inlined_call_operand.vmem [shape: f32[2,18,18,8], index: 0, kind: input, shape index: {}]   ;;  %s6684_s1 = inlined_call_operand.vmem [shape: f32[9,8,128], index: 1, kind: input, shape index: {}]   ;;  %s6685_s2 = inlined_call_operand.vmem [shape: f32[1,128], index: 2, kind: input, shape index: {}]   ;;  %s6686_s3 = inlined_call_operand.vmem [shape: f32[128,128], index: 3, kind: input, shape index: {}]   ;;  %s6687_s4 = inlined_call_operand.vmem [shape: f32[1,128], index: 4, kind: input, shape index: {}]   ;;  %s6688_s5 = inlined_call_operand.vmem [shape: f32[2,128], index: 5, kind: output, shape index: {}]  }
   0x1   :  { %s5641_s20 = smov 0  }
   0x2 LB: > { %s24_s21 = sadd.s32 1, %s5597_s19  ;;  %p3968_p0 = scmp.ge.s32.totalorder %s5601_s20, 1  ;;  %s5601_s20 = sphi %s5641_s20, %s15_s20   ;;  %s5597_s19 = sphi %s5639_s19, %s6800_s19   ;;  %s5593_s18 = sphi %s5637_s18, %s6799_s18  }
   0x3   : > { %p25_p1 = scmp.ge.s32.totalorder %s24_s21, 2  ;;  %p201_p2 = scmp.lt.s32.totalorder %s5601_s20, 3 }
   0x5   : > { %s6802_s21 = smov (%p25_p1, %s24_s21), 0  ;;  %p202_p3 = pnand %p3968_p0, %p201_p2 }
   0x7   : > { %205 = sbr.rel (%p202_p3) target bundleno = 773 (0x305), region = 40 }
   0xe   : > { %p3969_p4 = scmp.ne.s32.totalorder %s5593_s18, 0 }
   0xf   : > { %v5603_v0 = vmov (!%p3969_p4), 0.0  }
  0x10   : > { %243 = sbr.rel (%p3969_p4) target bundleno = 23 (0x17), region = 44  ;;  %244 = vst [vmem:[#allocation2] sm:$0x3] (!%p3969_p4), %v5603_v0 }
  0x17 PF: > { %v3972_v1 = vld [vmem:[%s6684_s1 + $0x8] sm:$0xff]  ;;  %v5664_v2 = vld [vmem:[%s6684_s1 + $0x20] sm:$0xff]  ;;  %s3971_s26 = smul.u32 192, %s5593_s18  ;;  %vm316_vm0 = vcmask 64512   ;;  %v4301_v10 = vld [vmem:[%s6684_s1 + $0x30] sm:$0xff]  ;;  %vm3789_vm1 = vcmask 1041409  }
  0x18   : > { %v281_v3 = vld [vmem:[%s6684_s1] sm:$0xff]  ;;  %4784 = vmatprep.subr.mxu1 %v3972_v1  ;;  %4984 = vmatprep.subr.mxu0 %v5664_v2  ;;  %v4234_v4 = vld [vmem:[%s6684_s1 + $0x28] sm:$0xff]  ;;  %v5697_v11 = vld [vmem:[%s6684_s1 + $0x10] sm:$0xff]  ;;  %p4465_p5 = scmp.ne.s32.totalorder %s5593_s18, 1 }
  0x19   : > { %4785 = vmatpush3.msra.mxu1 %v3972_v1  ;;  %4985 = vmatpush3.msra.mxu0 %v5664_v2  ;;  %s5678_s8 = scalar_lea.vmem %s6683_s0, %s3971_s26  ;;  %v5813_v31 = vld [vmem:[%s6684_s1 + $0x38] sm:$0xff]  ;;  %vm5605_vm2 = vmmov (!%p4465_p5), 0  }
  0x1a   : > { %v282_v5 = vld [vmem:[%s5678_s8 + $0x1] sm:$0xff]  ;;  %4834 = vmatprep.subr.mxu1 %v281_v3  ;;  %v4137_v6 = vld [vmem:[%s5678_s8 + $0x19] sm:$0xff]  ;;  %5034 = vmatprep.subr.mxu0 %v4234_v4  ;;  %v283_v7 = vld [vmem:[%s5678_s8 + $0x9] sm:$0xff] }
  0x1b   : > { %4786 = vmatprep.mubr.msk.f32.mxu1 %vm316_vm0, %v282_v5  ;;  %4986 = vmatprep.mubr.msk.f32.mxu0 %vm316_vm0, %v4137_v6  ;;  %v4138_v8 = vld [vmem:[%s5678_s8 + $0x21] sm:$0xff]  ;;  %v5687_v9 = vld [vmem:[%s5678_s8 + $0x31] sm:$0xff]  ;;  %v5700_v12 = vld [vmem:[%s5678_s8 + $0x39] sm:$0xff] }
  0x1c   : > { %4787 = vmatmul.mubr.msk.f32.vlgmr.msra.gmra.mrb[0].mxu1 %vm316_vm0, %v283_v7  ;;  %4987 = vmatmul.mubr.msk.f32.vlgmr.msra.gmra.mrb[0].mxu0 %vm316_vm0, %v4138_v8  ;;  %v5706_v13 = vld [vmem:[%s5678_s8 + $0x49] sm:$0xff]  ;;  %v5717_v14 = vld [vmem:[%s5678_s8 + $0x51] sm:$0xff]  ;;  %v5720_v15 = vld [vmem:[%s5678_s8 + $0x61] sm:$0xff] }
  0x1d   : > { %4835 = vmatpush3.msra.mxu1 %v281_v3  ;;  %5035 = vmatpush3.msra.mxu0 %v4234_v4  ;;  %v5731_v16 = vld [vmem:[%s5678_s8 + $0x69] sm:$0xff]  ;;  %v5734_v17 = vld [vmem:[%s5678_s8 + $0x79] sm:$0xff]  ;;  %v5745_v18 = vld [vmem:[%s5678_s8 + $0x81] sm:$0xff] }
  0x1e   : > { %4789 = vmatprep.mubr.msk.f32.mxu1 %vm316_vm0, %v4137_v6  ;;  %4989 = vmatprep.mubr.msk.f32.mxu0 %vm316_vm0, %v5687_v9  ;;  %v5748_v19 = vld [vmem:[%s5678_s8 + $0x91] sm:$0xff]  ;;  %v5759_v20 = vld [vmem:[%s5678_s8 + $0x99] sm:$0xff]  ;;  %v5762_v21 = vld [vmem:[%s5678_s8 + $0xa9] sm:$0xff] }
  0x1f   : > { %5084 = vmatprep.subr.mxu0 %v4301_v10  ;;  %4884 = vmatprep.subr.mxu1 %v5697_v11  ;;  %v5773_v22 = vld [vmem:[%s5678_s8 + $0xb1] sm:$0xff]  ;;  %v5776_v23 = vld [vmem:[%s5678_s8 + $0xc1] sm:$0xff]  ;;  %v5787_v24 = vld [vmem:[%s5678_s8 + $0xc9] sm:$0xff] }
  0x20   : > { %4790 = vmatmul.mubr.msk.f32.gmra.mrb[2].mxu1 %vm316_vm0, %v4138_v8  ;;  %4990 = vmatmul.mubr.msk.f32.gmra.mrb[2].mxu0 %vm316_vm0, %v5700_v12  ;;  %v298_v25 = vld [vmem:[%s5678_s8 + $0x1b1] sm:$0xff]  ;;  %v5791_v26 = vld [vmem:[%s5678_s8 + $0x1a] sm:$0xff]  ;;  %v5802_v28 = vld [vmem:[%s5678_s8 + $0x22] sm:$0xff] }
  0x21   : > { %4792 = vmatprep.mubr.msk.f32.mxu1 %vm316_vm0, %v5687_v9  ;;  %4992 = vmatprep.mubr.msk.f32.mxu0 %vm316_vm0, %v5706_v13  ;;  %v299_v27 = vld [vmem:[%s5678_s8 + $0x1b9] sm:$0xff]  ;;  %v5805_v29 = vld [vmem:[%s5678_s8 + $0x1c9] sm:$0xff]  ;;  %v5821_v32 = vld [vmem:[%s5678_s8 + $0x1d1] sm:$0xff] }
  0x22   : > { %6733 = vst [vmem:[#allocation3_spill] sm:$0xff] %v5805_v29  ;;  %v5808_v30 = vld [vmem:[%s5678_s8 + $0x32] sm:$0xff]  ;;  %6734 = vst [vmem:[#allocation4_spill] sm:$0xff] %v5821_v32  ;;  %v5824_v33 = vld [vmem:[%s5678_s8 + $0x3a] sm:$0xff] }
  0x23   : > { %v5829_v34 = vld [vmem:[%s5678_s8 + $0x1e1] sm:$0xff]  ;;  %v5832_v35 = vld [vmem:[%s5678_s8 + $0x4a] sm:$0xff]  ;;  %v5847_v37 = vld [vmem:[%s5678_s8 + $0x52] sm:$0xff] }
  0x24   : > { %4793 = vmatmul.mubr.msk.f32.gmra.mrb[4].mxu1 %vm316_vm0, %v5700_v12  ;;  %4993 = vmatmul.mubr.msk.f32.gmra.mrb[4].mxu0 %vm316_vm0, %v5717_v14  ;;  %v5844_v36 = vld [vmem:[%s5678_s8 + $0x1e9] sm:$0xff]  ;;  %v5850_v38 = vld [vmem:[%s5678_s8 + $0x1f9] sm:$0xff]  ;;  %v5864_v40 = vld [vmem:[%s5678_s8 + $0x201] sm:$0xff] }
  0x25   : > { %4795 = vmatprep.mubr.msk.f32.mxu1 %vm316_vm0, %v5706_v13  ;;  %4995 = vmatprep.mubr.msk.f32.mxu0 %vm316_vm0, %v5720_v15  ;;  %6735 = vst [vmem:[#allocation5_spill] sm:$0xff] %v5844_v36  ;;  %6736 = vst [vmem:[#allocation6_spill] sm:$0xff] %v5850_v38  ;;  %v5853_v39 = vld [vmem:[%s5678_s8 + $0x62] sm:$0xff]  ;;  %v5867_v41 = vld [vmem:[%s5678_s8 + $0x6a] sm:$0xff] }
  0x26   : > { %6737 = vst [vmem:[#allocation7_spill] sm:$0xff] %v5864_v40  ;;  %v5870_v42 = vld [vmem:[%s5678_s8 + $0x211] sm:$0xff]  ;;  %v5873_v43 = vld [vmem:[%s5678_s8 + $0x7a] sm:$0xff]  ;;  %v5887_v45 = vld [vmem:[%s5678_s8 + $0x82] sm:$0xff] }
  0x27   : > { %6738 = vst [vmem:[#allocation8_spill] sm:$0xff] %v5870_v42  ;;  %v5884_v44 = vld [vmem:[%s5678_s8 + $0x219] sm:$0xff]  ;;  %v5890_v46 = vld [vmem:[%s5678_s8 + $0x229] sm:$0xff]  ;;  %v5904_v48 = vld [vmem:[%s5678_s8 + $0x231] sm:$0xff] }
  0x28   : > { %4796 = vmatmul.mubr.msk.f32.gmra.mrb[6].mxu1 %vm316_vm0, %v5717_v14  ;;  %4996 = vmatmul.mubr.msk.f32.gmra.mrb[6].mxu0 %vm316_vm0, %v5731_v16  ;;  %6739 = vst [vmem:[#allocation9_spill] sm:$0xff] %v5884_v44  ;;  %6740 = vst [vmem:[#allocation10_spill] sm:$0xff] %v5890_v46  ;;  %v5893_v47 = vld [vmem:[%s5678_s8 + $0x92] sm:$0xff]  ;;  %v5907_v49 = vld [vmem:[%s5678_s8 + $0x9a] sm:$0xff] }
  0x29   : > { %4798 = vmatprep.mubr.msk.f32.mxu1 %vm316_vm0, %v5720_v15  ;;  %4998 = vmatprep.mubr.msk.f32.mxu0 %vm316_vm0, %v5734_v17  ;;  %6741 = vst [vmem:[#allocation11_spill] sm:$0xff] %v5904_v48  ;;  %v5910_v50 = vld [vmem:[%s5678_s8 + $0x241] sm:$0xff]  ;;  %v5913_v51 = vld [vmem:[%s5678_s8 + $0xaa] sm:$0xff]  ;;  %v5927_v53 = vld [vmem:[%s5678_s8 + $0xb2] sm:$0xff] }
  0x2a   : > { %6742 = vst [vmem:[#allocation12_spill] sm:$0xff] %v5910_v50  ;;  %v5924_v52 = vld [vmem:[%s5678_s8 + $0x249] sm:$0xff]  ;;  %v5930_v54 = vld [vmem:[%s5678_s8 + $0x259] sm:$0xff]  ;;  %v5944_v56 = vld [vmem:[%s5678_s8 + $0x261] sm:$0xff] }
  0x2b   : > { %6743 = vst [vmem:[#allocation13_spill] sm:$0xff] %v5924_v52  ;;  %6744 = vst [vmem:[#allocation14_spill] sm:$0xff] %v5930_v54  ;;  %v5933_v55 = vld [vmem:[%s5678_s8 + $0xc2] sm:$0xff]  ;;  %v5947_v57 = vld [vmem:[%s5678_s8 + $0xca] sm:$0xff] }
  0x2c   : > { %4799 = vmatmul.mubr.msk.f32.gmra.mrb[8].mxu1 %vm316_vm0, %v5731_v16  ;;  %4999 = vmatmul.mubr.msk.f32.gmra.mrb[8].mxu0 %vm316_vm0, %v5745_v18  ;;  %6745 = vst [vmem:[#allocation15_spill] sm:$0xff] %v5933_v55  ;;  %6746 = vst [vmem:[#allocation16_spill] sm:$0xff] %v5944_v56  ;;  %v249_v58 = vld [vmem:[%s5678_s8] sm:$0xff]  ;;  %v5951_v59 = vld [vmem:[%s5678_s8 + $0x1ca] sm:$0xff] }
  0x2d   : > { %4801 = vmatprep.mubr.msk.f32.mxu1 %vm316_vm0, %v5734_v17  ;;  %5001 = vmatprep.mubr.msk.f32.mxu0 %vm316_vm0, %v5748_v19  ;;  %6747 = vst [vmem:[#allocation17_spill] sm:$0xff] %v5947_v57  ;;  %v250_v60 = vld [vmem:[%s5678_s8 + $0x8] sm:$0xff]  ;;  %v5962_v61 = vld [vmem:[%s5678_s8 + $0x1d2] sm:$0xff]  ;;  %v5982_v1 = vld [vmem:[%s5678_s8 + $0x20] sm:$0xff] }
  0x2e   : > { %v5965_v62 = vld [vmem:[%s5678_s8 + $0x18] sm:$0xff]  ;;  %v5968_v63 = vld [vmem:[%s5678_s8 + $0x1e2] sm:$0xff]  ;;  %6748 = vst [vmem:[#allocation18_spill] sm:$0xff] %v5982_v1  ;;  %v5985_v3 = vld [vmem:[%s5678_s8 + $0x1ea] sm:$0xff] }
  0x2f   : > { %v5973_v0 = vld [vmem:[%s6684_s1 + $0x18] sm:$0xff]  ;;  %v5990_v4 = vld [vmem:[%s5678_s8 + $0x30] sm:$0xff]  ;;  %v6008_v7 = vld [vmem:[%s5678_s8 + $0x202] sm:$0xff] }
  0x30   : > { %4802 = vmatmul.mubr.msk.f32.gmra.mrb[10].mxu1 %vm316_vm0, %v5745_v18  ;;  %5002 = vmatmul.mubr.msk.f32.gmra.mrb[10].mxu0 %vm316_vm0, %v5759_v20  ;;  %v5993_v5 = vld [vmem:[%s5678_s8 + $0x1fa] sm:$0xff]  ;;  %v6011_v8 = vld [vmem:[%s5678_s8 + $0x48] sm:$0xff] }
  0x31   : > { %4804 = vmatprep.mubr.msk.f32.mxu1 %vm316_vm0, %v5748_v19  ;;  %5004 = vmatprep.mubr.msk.f32.mxu0 %vm316_vm0, %v5762_v21  ;;  %v6005_v6 = vld [vmem:[%s5678_s8 + $0x38] sm:$0xff]  ;;  %6750 = vst [vmem:[#allocation20_spill] sm:$0xff] %v6011_v8 }
  0x32   : > { %6749 = vst [vmem:[#allocation19_spill] sm:$0xff] %v6005_v6 }
  0x34   : > { %4805 = vmatmul.mubr.msk.f32.gmra.mrb[12].mxu1 %vm316_vm0, %v5759_v20  ;;  %5005 = vmatmul.mubr.msk.f32.gmra.mrb[12].mxu0 %vm316_vm0, %v5773_v22 }
  0x35   : > { %4807 = vmatprep.mubr.msk.f32.mxu1 %vm316_vm0, %v5762_v21  ;;  %5007 = vmatprep.mubr.msk.f32.mxu0 %vm316_vm0, %v5776_v23 }
  0x38   : > { %4808 = vmatmul.mubr.msk.f32.gmra.mrb[14].mxu1 %vm316_vm0, %v5773_v22  ;;  %5008 = vmatmul.mubr.msk.f32.gmra.mrb[14].mxu0 %vm316_vm0, %v5787_v24 }
  0x39   : > { %4810 = vmatprep.mubr.msk.f32.mxu1 %vm316_vm0, %v298_v25  ;;  %5036 = vmatprep.mubr.msk.f32.mxu0 %vm316_vm0, %v5791_v26  ;;  %v6028_v25 = vld [vmem:[%s5678_s8 + $0x21a] sm:$0xff] }
  0x3c   : > { %4811 = vmatmul.mubr.msk.f32.gmra.mrb[16].mxu1 %vm316_vm0, %v299_v27  ;;  %5037 = vmatmul.mubr.msk.f32.vlgmr.msra.gmra.mrb[0].mxu0 %vm316_vm0, %v5802_v28  ;;  %v6031_v27 = vld [vmem:[%s5678_s8 + $0x60] sm:$0xff] }
  0x3d   : > { %5085 = vmatpush3.msra.mxu0 %v4301_v10  ;;  %4813 = vmatprep.mubr.msk.f32.mxu1 %vm316_vm0, %v5805_v29  ;;  %v6014_v10 = vld [vmem:[%s5678_s8 + $0x212] sm:$0xff]  ;;  %6752 = vst [vmem:[#allocation22_spill] sm:$0xff] %v6031_v27 }
  0x3e   : > { %5039 = vmatprep.mubr.msk.f32.mxu0 %vm316_vm0, %v5808_v30  ;;  %5134 = vmatprep.subr.mxu0 %v5813_v31  ;;  %v6051_v29 = vld [vmem:[%s5678_s8 + $0x78] sm:$0xff] }
  0x3f   : > { %6754 = vst [vmem:[#allocation24_spill] sm:$0xff] %v6051_v29 }
  0x40   : > { %4814 = vmatmul.mubr.msk.f32.gmra.mrb[18].mxu1 %vm316_vm0, %v5821_v32  ;;  %5040 = vmatmul.mubr.msk.f32.gmra.mrb[2].mxu0 %vm316_vm0, %v5824_v33  ;;  %v6048_v32 = vld [vmem:[%s5678_s8 + $0x232] sm:$0xff] }
  0x41   : > { %4816 = vmatprep.mubr.msk.f32.mxu1 %vm316_vm0, %v5829_v34  ;;  %5042 = vmatprep.mubr.msk.f32.mxu0 %vm316_vm0, %v5832_v35 }
  0x44   : > { %4817 = vmatmul.mubr.msk.f32.gmra.mrb[20].mxu1 %vm316_vm0, %v5844_v36  ;;  %5043 = vmatmul.mubr.msk.f32.gmra.mrb[4].mxu0 %vm316_vm0, %v5847_v37  ;;  %v266_v36 = vld [vmem:[%s5678_s8 + $0x1b8] sm:$0xff] }
  0x45   : > { %4819 = vmatprep.mubr.msk.f32.mxu1 %vm316_vm0, %v5850_v38  ;;  %5045 = vmatprep.mubr.msk.f32.mxu0 %vm316_vm0, %v5853_v39  ;;  %v265_v38 = vld [vmem:[%s5678_s8 + $0x1b0] sm:$0xff] }
  0x48   : > { %4820 = vmatmul.mubr.msk.f32.gmra.mrb[22].mxu1 %vm316_vm0, %v5864_v40  ;;  %5046 = vmatmul.mubr.msk.f32.gmra.mrb[6].mxu0 %vm316_vm0, %v5867_v41  ;;  %v6108_v40 = vld [vmem:[%s5678_s8 + $0x27a] sm:$0xff] }
  0x49   : > { %4822 = vmatprep.mubr.msk.f32.mxu1 %vm316_vm0, %v5870_v42  ;;  %5048 = vmatprep.mubr.msk.f32.mxu0 %vm316_vm0, %v5873_v43  ;;  %v6105_v42 = vld [vmem:[%s5678_s8 + $0xb0] sm:$0xff]  ;;  %6761 = vst [vmem:[#allocation31_spill] sm:$0xff] %v6108_v40 }
  0x4a   : > { %6760 = vst [vmem:[#allocation30_spill] sm:$0xff] %v6105_v42 }
  0x4c   : > { %4823 = vmatmul.mubr.msk.f32.gmra.mrb[24].mxu1 %vm316_vm0, %v5884_v44  ;;  %5049 = vmatmul.mubr.msk.f32.gmra.mrb[8].mxu0 %vm316_vm0, %v5887_v45  ;;  %v6094_v44 = vld [vmem:[%s5678_s8 + $0x272] sm:$0xff] }
  0x4d   : > { %4825 = vmatprep.mubr.msk.f32.mxu1 %vm316_vm0, %v5890_v46  ;;  %5051 = vmatprep.mubr.msk.f32.mxu0 %vm316_vm0, %v5893_v47  ;;  %v6091_v46 = vld [vmem:[%s5678_s8 + $0xa8] sm:$0xff]  ;;  %6759 = vst [vmem:[#allocation29_spill] sm:$0xff] %v6094_v44 }
  0x4e   : > { %6758 = vst [vmem:[#allocation28_spill] sm:$0xff] %v6091_v46 }
  0x50   : > { %4826 = vmatmul.mubr.msk.f32.gmra.mrb[26].mxu1 %vm316_vm0, %v5904_v48  ;;  %5052 = vmatmul.mubr.msk.f32.gmra.mrb[10].mxu0 %vm316_vm0, %v5907_v49  ;;  %v6088_v48 = vld [vmem:[%s5678_s8 + $0x262] sm:$0xff] }
  0x51   : > { %4828 = vmatprep.mubr.msk.f32.mxu1 %vm316_vm0, %v5910_v50  ;;  %5054 = vmatprep.mubr.msk.f32.mxu0 %vm316_vm0, %v5913_v51  ;;  %v6085_v50 = vld [vmem:[%s5678_s8 + $0x98] sm:$0xff] }
  0x52   : > { %6757 = vst [vmem:[#allocation27_spill] sm:$0xff] %v6085_v50 }
  0x54   : > { %4829 = vmatmul.mubr.msk.f32.gmra.mrb[28].mxu1 %vm316_vm0, %v5924_v52  ;;  %5055 = vmatmul.mubr.msk.f32.gmra.mrb[12].mxu0 %vm316_vm0, %v5927_v53  ;;  %v6074_v52 = vld [vmem:[%s5678_s8 + $0x25a] sm:$0xff] }
  0x55   : > { %4831 = vmatprep.mubr.msk.f32.mxu1 %vm316_vm0, %v5930_v54  ;;  %5057 = vmatprep.mubr.msk.f32.mxu0 %vm316_vm0, %v5933_v55  ;;  %v6065_v55 = vld [vmem:[%s5678_s8 + $0x80] sm:$0xff]  ;;  %v6071_v54 = vld [vmem:[%s5678_s8 + $0x90] sm:$0xff] }
  0x56   : > { %6755 = vst [vmem:[#allocation25_spill] sm:$0xff] %v6065_v55  ;;  %6756 = vst [vmem:[#allocation26_spill] sm:$0xff] %v6071_v54 }
  0x58   : > { %4832 = vmatmul.mubr.msk.f32.gmra.mrb[30].mxu1 %vm316_vm0, %v5944_v56  ;;  %5058 = vmatmul.mubr.msk.f32.gmra.mrb[14].mxu0 %vm316_vm0, %v5947_v57  ;;  %v6054_v57 = vld [vmem:[%s5678_s8 + $0x242] sm:$0xff]  ;;  %v6068_v56 = vld [vmem:[%s5678_s8 + $0x24a] sm:$0xff] }
  0x59   : > { %4836 = vmatprep.mubr.msk.f32.mxu1 %vm316_vm0, %v249_v58  ;;  %5060 = vmatprep.mubr.msk.f32.mxu0 %vm316_vm0, %v5951_v59  ;;  %v6034_v58 = vld [vmem:[%s5678_s8 + $0x22a] sm:$0xff] }
  0x5c   : > { %4837 = vmatmul.mubr.msk.f32.vlgmr.msra.gmra.mrb[0].mxu1 %vm316_vm0, %v250_v60  ;;  %5061 = vmatmul.mubr.msk.f32.gmra.mrb[16].mxu0 %vm316_vm0, %v5962_v61  ;;  %v6045_v60 = vld [vmem:[%s5678_s8 + $0x68] sm:$0xff] }
  0x5d   : > { %4885 = vmatpush3.msra.mxu1 %v5697_v11  ;;  %4839 = vmatprep.mubr.msk.f32.mxu1 %vm316_vm0, %v5965_v62  ;;  %v6025_v11 = vld [vmem:[%s5678_s8 + $0x50] sm:$0xff]  ;;  %6753 = vst [vmem:[#allocation23_spill] sm:$0xff] %v6045_v60 }
  0x5e   : > { %5063 = vmatprep.mubr.msk.f32.mxu0 %vm316_vm0, %v5968_v63  ;;  %4934 = vmatprep.subr.mxu1 %v5973_v0  ;;  %6751 = vst [vmem:[#allocation21_spill] sm:$0xff] %v6025_v11 }
  0x60   : > { %4840 = vmatmul.mubr.msk.f32.gmra.mrb[2].mxu1 %vm316_vm0, %v5982_v1  ;;  %5064 = vmatmul.mubr.msk.f32.gmra.mrb[18].mxu0 %vm316_vm0, %v5985_v3  ;;  %v6125_v1 = vld [vmem:[%s6684_s1 + $0x40] sm:$0xff] }
  0x61   : > { %4842 = vmatprep.mubr.msk.f32.mxu1 %vm316_vm0, %v5990_v4  ;;  %5066 = vmatprep.mubr.msk.f32.mxu0 %vm316_vm0, %v5993_v5 }
  0x64   : > { %4843 = vmatmul.mubr.msk.f32.gmra.mrb[4].mxu1 %vm316_vm0, %v6005_v6  ;;  %5067 = vmatmul.mubr.msk.f32.gmra.mrb[20].mxu0 %vm316_vm0, %v6008_v7 }
  0x65   : > { %4845 = vmatprep.mubr.msk.f32.mxu1 %vm316_vm0, %v6011_v8  ;;  %5069 = vmatprep.mubr.msk.f32.mxu0 %vm316_vm0, %v6014_v10 }
  0x68   : > { %4846 = vmatmul.mubr.msk.f32.gmra.mrb[6].mxu1 %vm316_vm0, %v6025_v11  ;;  %5070 = vmatmul.mubr.msk.f32.gmra.mrb[22].mxu0 %vm316_vm0, %v6028_v25 }
  0x69   : > { %4848 = vmatprep.mubr.msk.f32.mxu1 %vm316_vm0, %v6031_v27  ;;  %5072 = vmatprep.mubr.msk.f32.mxu0 %vm316_vm0, %v6034_v58 }
  0x6c   : > { %4849 = vmatmul.mubr.msk.f32.gmra.mrb[8].mxu1 %vm316_vm0, %v6045_v60  ;;  %5073 = vmatmul.mubr.msk.f32.gmra.mrb[24].mxu0 %vm316_vm0, %v6048_v32 }
  0x6d   : > { %4851 = vmatprep.mubr.msk.f32.mxu1 %vm316_vm0, %v6051_v29  ;;  %5075 = vmatprep.mubr.msk.f32.mxu0 %vm316_vm0, %v6054_v57 }
  0x70   : > { %4852 = vmatmul.mubr.msk.f32.gmra.mrb[10].mxu1 %vm316_vm0, %v6065_v55  ;;  %5076 = vmatmul.mubr.msk.f32.gmra.mrb[26].mxu0 %vm316_vm0, %v6068_v56 }
  0x71   : > { %4854 = vmatprep.mubr.msk.f32.mxu1 %vm316_vm0, %v6071_v54  ;;  %5078 = vmatprep.mubr.msk.f32.mxu0 %vm316_vm0, %v6074_v52 }
  0x74   : > { %4855 = vmatmul.mubr.msk.f32.gmra.mrb[12].mxu1 %vm316_vm0, %v6085_v50  ;;  %5079 = vmatmul.mubr.msk.f32.gmra.mrb[28].mxu0 %vm316_vm0, %v6088_v48 }
  0x75   : > { %4857 = vmatprep.mubr.msk.f32.mxu1 %vm316_vm0, %v6091_v46  ;;  %5081 = vmatprep.mubr.msk.f32.mxu0 %vm316_vm0, %v6094_v44  ;;  %v6120_v44 = vld [vmem:[%s5678_s8 + $0x1c8] sm:$0xff] }
  0x76   : > { %6762 = vst [vmem:[#allocation32_spill] sm:$0xff] %v6120_v44 }
  0x78   : > { %4858 = vmatmul.mubr.msk.f32.gmra.mrb[14].mxu1 %vm316_vm0, %v6105_v42  ;;  %5082 = vmatmul.mubr.msk.f32.gmra.mrb[30].mxu0 %vm316_vm0, %v6108_v40  ;;  %v6139_v40 = vld [vmem:[%s5678_s8 + $0x1e0] sm:$0xff] }
  0x79   : > { %4860 = vmatprep.mubr.msk.f32.mxu1 %vm316_vm0, %v265_v38  ;;  %5086 = vmatprep.mubr.msk.f32.mxu0 %vm316_vm0, %v5990_v4  ;;  %v6134_v38 = vld [vmem:[%s5678_s8 + $0x1d0] sm:$0xff] }
  0x7a   : > { %6763 = vst [vmem:[#allocation33_spill] sm:$0xff] %v6134_v38 }
  0x7c   : > { %4861 = vmatmul.mubr.msk.f32.gmra.mrb[16].mxu1 %vm316_vm0, %v266_v36  ;;  %5087 = vmatmul.mubr.msk.f32.vlgmr.msra.gmra.mrb[0].mxu0 %vm316_vm0, %v6005_v6  ;;  %v6154_v36 = vld [vmem:[%s5678_s8 + $0x1f8] sm:$0xff]  ;;  %v959_v6 = vld [vmem:[%s5678_s8 + $0x2] sm:$0xff] }
  0x7d   : > { %5135 = vmatpush3.msra.mxu0 %v5813_v31  ;;  %4863 = vmatprep.mubr.msk.f32.mxu1 %vm316_vm0, %v6120_v44  ;;  %v6151_v31 = vld [vmem:[%s5678_s8 + $0x1e8] sm:$0xff]  ;;  %v6168_v44 = vld [vmem:[%s5678_s8 + $0x210] sm:$0xff] }
  0x7e   : > { %5089 = vmatprep.mubr.msk.f32.mxu0 %vm316_vm0, %v6011_v8  ;;  %5184 = vmatprep.subr.mxu0 %v6125_v1  ;;  %v4283_v8 = vld [vmem:[%s5678_s8 + $0xd8] sm:$0xff] }
  0x80   : > { %4864 = vmatmul.mubr.msk.f32.gmra.mrb[18].mxu1 %vm316_vm0, %v6134_v38  ;;  %5090 = vmatmul.mubr.msk.f32.gmra.mrb[2].mxu0 %vm316_vm0, %v6025_v11  ;;  %v6165_v38 = vld [vmem:[%s5678_s8 + $0x200] sm:$0xff]  ;;  %v6216_v11 = vld [vmem:[%s5678_s8 + $0x258] sm:$0xff] }
  0x81   : > { %4866 = vmatprep.mubr.msk.f32.mxu1 %vm316_vm0, %v6139_v40  ;;  %5092 = vmatprep.mubr.msk.f32.mxu0 %vm316_vm0, %v6031_v27  ;;  %v6199_v27 = vld [vmem:[%s5678_s8 + $0xc0] sm:$0xff] }
  0x82   : > { %6764 = vst [vmem:[#allocation34_spill] sm:$0xff] %v6199_v27 }
  0x84   : > { %4867 = vmatmul.mubr.msk.f32.gmra.mrb[20].mxu1 %vm316_vm0, %v6151_v31  ;;  %5093 = vmatmul.mubr.msk.f32.gmra.mrb[4].mxu0 %vm316_vm0, %v6045_v60  ;;  %v6182_v60 = vld [vmem:[%s5678_s8 + $0x228] sm:$0xff] }
  0x85   : > { %4869 = vmatprep.mubr.msk.f32.mxu1 %vm316_vm0, %v6154_v36  ;;  %5095 = vmatprep.mubr.msk.f32.mxu0 %vm316_vm0, %v6051_v29  ;;  %v6179_v29 = vld [vmem:[%s5678_s8 + $0x218] sm:$0xff] }
  0x88   : > { %4870 = vmatmul.mubr.msk.f32.gmra.mrb[22].mxu1 %vm316_vm0, %v6165_v38  ;;  %5096 = vmatmul.mubr.msk.f32.gmra.mrb[6].mxu0 %vm316_vm0, %v6065_v55  ;;  %v6196_v55 = vld [vmem:[%s5678_s8 + $0x240] sm:$0xff] }
  0x89   : > { %4872 = vmatprep.mubr.msk.f32.mxu1 %vm316_vm0, %v6168_v44  ;;  %5098 = vmatprep.mubr.msk.f32.mxu0 %vm316_vm0, %v6071_v54  ;;  %v6193_v54 = vld [vmem:[%s5678_s8 + $0x230] sm:$0xff] }
  0x8c   : > { %4873 = vmatmul.mubr.msk.f32.gmra.mrb[24].mxu1 %vm316_vm0, %v6179_v29  ;;  %5099 = vmatmul.mubr.msk.f32.gmra.mrb[8].mxu0 %vm316_vm0, %v6085_v50  ;;  %v6213_v50 = vld [vmem:[%s5678_s8 + $0xc8] sm:$0xff] }
  0x8d   : > { %4875 = vmatprep.mubr.msk.f32.mxu1 %vm316_vm0, %v6182_v60  ;;  %5101 = vmatprep.mubr.msk.f32.mxu0 %vm316_vm0, %v6091_v46  ;;  %v6210_v46 = vld [vmem:[%s5678_s8 + $0x248] sm:$0xff]  ;;  %6765 = vst [vmem:[#allocation35_spill] sm:$0xff] %v6213_v50 }
  0x90   : > { %4876 = vmatmul.mubr.msk.f32.gmra.mrb[26].mxu1 %vm316_vm0, %v6193_v54  ;;  %5102 = vmatmul.mubr.msk.f32.gmra.mrb[10].mxu0 %vm316_vm0, %v6105_v42  ;;  %v4284_v42 = vld [vmem:[%s5678_s8 + $0xe0] sm:$0xff] }
  0x91   : > { %4878 = vmatprep.mubr.msk.f32.mxu1 %vm316_vm0, %v6196_v55  ;;  %5104 = vmatprep.mubr.msk.f32.mxu0 %vm316_vm0, %v6199_v27  ;;  %v6227_v27 = vld [vmem:[%s5678_s8 + $0x260] sm:$0xff] }
  0x94   : > { %4879 = vmatmul.mubr.msk.f32.gmra.mrb[28].mxu1 %vm316_vm0, %v6210_v46  ;;  %5105 = vmatmul.mubr.msk.f32.gmra.mrb[12].mxu0 %vm316_vm0, %v6213_v50  ;;  %v960_v50 = vld [vmem:[%s5678_s8 + $0xa] sm:$0xff] }
  0x95   : > { %4881 = vmatprep.mubr.msk.f32.mxu1 %vm316_vm0, %v6216_v11  ;;  %5107 = vmatprep.mubr.msk.f32.mxu0 %vm316_vm0, %v4283_v8  ;;  %v6784_v8 = vld [vmem:[#allocation14_spill] sm:$0xff] }
  0x98   : > { %4882 = vmatmul.mubr.msk.f32.gmra.mrb[30].mxu1 %vm316_vm0, %v6227_v27  ;;  %5108 = vmatmul.mubr.msk.f32.gmra.mrb[14].mxu0 %vm316_vm0, %v4284_v42  ;;  %v4299_v42 = vld [vmem:[%s5678_s8 + $0x288] sm:$0xff] }
  0x99   : > { %4886 = vmatprep.mubr.msk.f32.mxu1 %vm316_vm0, %v959_v6  ;;  %5110 = vmatprep.mubr.msk.f32.mxu0 %vm316_vm0, %v6139_v40  ;;  %v976_v6 = vld [vmem:[%s5678_s8 + $0x1ba] sm:$0xff] }
  0x9c   : > { %4887 = vmatmul.mubr.msk.f32.vlgmr.msra.gmra.mrb[0].mxu1 %vm316_vm0, %v960_v50  ;;  %5111 = vmatmul.mubr.msk.f32.gmra.mrb[16].mxu0 %vm316_vm0, %v6151_v31  ;;  %v4300_v50 = vld [vmem:[%s5678_s8 + $0x290] sm:$0xff] }
  0x9d   : > { %4935 = vmatpush3.msra.mxu1 %v5973_v0  ;;  %4889 = vmatprep.mubr.msk.f32.mxu1 %vm316_vm0, %v5791_v26  ;;  %v6280_v26 = vld [vmem:[%s5678_s8 + $0x270] sm:$0xff] }
  0x9e   : > { %5113 = vmatprep.mubr.msk.f32.mxu0 %vm316_vm0, %v6154_v36  ;;  %5293 = vmatprep.subr.mxu1 %v5664_v2  ;;  %v975_v0 = vld [vmem:[%s5678_s8 + $0x1b2] sm:$0xff] }
  0xa0   : > { %4890 = vmatmul.mubr.msk.f32.gmra.mrb[2].mxu1 %vm316_vm0, %v5802_v28  ;;  %5114 = vmatmul.mubr.msk.f32.gmra.mrb[18].mxu0 %vm316_vm0, %v6165_v38  ;;  %v6291_v28 = vld [vmem:[%s5678_s8 + $0x278] sm:$0xff] }
  0xa1   : > { %4892 = vmatprep.mubr.msk.f32.mxu1 %vm316_vm0, %v5808_v30  ;;  %5116 = vmatprep.mubr.msk.f32.mxu0 %vm316_vm0, %v6168_v44 }
  0xa4   : > { %4893 = vmatmul.mubr.msk.f32.gmra.mrb[4].mxu1 %vm316_vm0, %v5824_v33  ;;  %5117 = vmatmul.mubr.msk.f32.gmra.mrb[20].mxu0 %vm316_vm0, %v6179_v29 }
  0xa5   : > { %4895 = vmatprep.mubr.msk.f32.mxu1 %vm316_vm0, %v5832_v35  ;;  %5119 = vmatprep.mubr.msk.f32.mxu0 %vm316_vm0, %v6182_v60 }
  0xa8   : > { %4896 = vmatmul.mubr.msk.f32.gmra.mrb[6].mxu1 %vm316_vm0, %v5847_v37  ;;  %5120 = vmatmul.mubr.msk.f32.gmra.mrb[22].mxu0 %vm316_vm0, %v6193_v54 }
  0xa9   : > { %4898 = vmatprep.mubr.msk.f32.mxu1 %vm316_vm0, %v5853_v39  ;;  %5122 = vmatprep.mubr.msk.f32.mxu0 %vm316_vm0, %v6196_v55 }
  0xac   : > { %4899 = vmatmul.mubr.msk.f32.gmra.mrb[8].mxu1 %vm316_vm0, %v5867_v41  ;;  %5123 = vmatmul.mubr.msk.f32.gmra.mrb[24].mxu0 %vm316_vm0, %v6210_v46 }
  0xad   : > { %4901 = vmatprep.mubr.msk.f32.mxu1 %vm316_vm0, %v5873_v43  ;;  %5125 = vmatprep.mubr.msk.f32.mxu0 %vm316_vm0, %v6216_v11 }
  0xb0   : > { %4902 = vmatmul.mubr.msk.f32.gmra.mrb[10].mxu1 %vm316_vm0, %v5887_v45  ;;  %5126 = vmatmul.mubr.msk.f32.gmra.mrb[26].mxu0 %vm316_vm0, %v6227_v27 }
  0xb1   : > { %4904 = vmatprep.mubr.msk.f32.mxu1 %vm316_vm0, %v5893_v47  ;;  %5128 = vmatprep.mubr.msk.f32.mxu0 %vm316_vm0, %v6280_v26 }
  0xb4   : > { %4905 = vmatmul.mubr.msk.f32.gmra.mrb[12].mxu1 %vm316_vm0, %v5907_v49  ;;  %5129 = vmatmul.mubr.msk.f32.gmra.mrb[28].mxu0 %vm316_vm0, %v6291_v28 }
  0xb5   : > { %4907 = vmatprep.mubr.msk.f32.mxu1 %vm316_vm0, %v5913_v51  ;;  %5131 = vmatprep.mubr.msk.f32.mxu0 %vm316_vm0, %v4299_v42  ;;  %v6416_v42 = vld [vmem:[%s5678_s8 + $0x271] sm:$0xff] }
  0xb8   : > { %4908 = vmatmul.mubr.msk.f32.gmra.mrb[14].mxu1 %vm316_vm0, %v5927_v53  ;;  %5132 = vmatmul.mubr.msk.f32.gmra.mrb[30].mxu0 %vm316_vm0, %v4300_v50  ;;  %v6785_v50 = vld [vmem:[#allocation27_spill] sm:$0xff] }
  0xb9   : > { %4910 = vmatprep.mubr.msk.f32.mxu1 %vm316_vm0, %v975_v0  ;;  %5136 = vmatprep.mubr.msk.f32.mxu0 %vm316_vm0, %v5687_v9  ;;  %v4348_v9 = vld [vmem:[%s5678_s8 + $0xd9] sm:$0xff]  ;;  %v6786_v0 = vld [vmem:[#allocation16_spill] sm:$0xff] }
  0xbc   : > { %4911 = vmatmul.mubr.msk.f32.gmra.mrb[16].mxu1 %vm316_vm0, %v976_v6  ;;  %5137 = vmatmul.mubr.msk.f32.vlgmr.msra.gmra.mrb[0].mxu0 %vm316_vm0, %v5700_v12  ;;  %v4349_v12 = vld [vmem:[%s5678_s8 + $0xe1] sm:$0xff]  ;;  %v6787_v6 = vld [vmem:[#allocation28_spill] sm:$0xff] }
  0xbd   : > { %5185 = vmatpush3.msra.mxu0 %v6125_v1  ;;  %4913 = vmatprep.mubr.msk.f32.mxu1 %vm316_vm0, %v5951_v59  ;;  %v6779_v59 = vld [vmem:[#allocation24_spill] sm:$0xff]  ;;  %v6782_v1 = vld [vmem:[#allocation13_spill] sm:$0xff] }
  0xbe   : > { %5139 = vmatprep.mubr.msk.f32.mxu0 %vm316_vm0, %v5706_v13  ;;  %v6766_v13 = vld [vmem:[#allocation18_spill] sm:$0xff] }
  0xc0   : > { %4914 = vmatmul.mubr.msk.f32.gmra.mrb[18].mxu1 %vm316_vm0, %v5962_v61  ;;  %5140 = vmatmul.mubr.msk.f32.gmra.mrb[2].mxu0 %vm316_vm0, %v5717_v14  ;;  %v6767_v14 = vld [vmem:[#allocation5_spill] sm:$0xff]  ;;  %v6780_v61 = vld [vmem:[#allocation12_spill] sm:$0xff] }
  0xc1   : > { %4916 = vmatprep.mubr.msk.f32.mxu1 %vm316_vm0, %v5968_v63  ;;  %5142 = vmatprep.mubr.msk.f32.mxu0 %vm316_vm0, %v5720_v15  ;;  %v6768_v15 = vld [vmem:[#allocation6_spill] sm:$0xff] }
  0xc4   : > { %4917 = vmatmul.mubr.msk.f32.gmra.mrb[20].mxu1 %vm316_vm0, %v5985_v3  ;;  %5143 = vmatmul.mubr.msk.f32.gmra.mrb[4].mxu0 %vm316_vm0, %v5731_v16  ;;  %v6769_v16 = vld [vmem:[#allocation19_spill] sm:$0xff] }
  0xc5   : > { %4919 = vmatprep.mubr.msk.f32.mxu1 %vm316_vm0, %v5993_v5  ;;  %5145 = vmatprep.mubr.msk.f32.mxu0 %vm316_vm0, %v5734_v17  ;;  %v6770_v17 = vld [vmem:[#allocation7_spill] sm:$0xff] }
  0xc8   : > { %4920 = vmatmul.mubr.msk.f32.gmra.mrb[22].mxu1 %vm316_vm0, %v6008_v7  ;;  %5146 = vmatmul.mubr.msk.f32.gmra.mrb[6].mxu0 %vm316_vm0, %v5745_v18  ;;  %v6771_v18 = vld [vmem:[#allocation20_spill] sm:$0xff] }
  0xc9   : > { %4922 = vmatprep.mubr.msk.f32.mxu1 %vm316_vm0, %v6014_v10  ;;  %5148 = vmatprep.mubr.msk.f32.mxu0 %vm316_vm0, %v5748_v19  ;;  %v6772_v19 = vld [vmem:[#allocation8_spill] sm:$0xff] }
  0xcc   : > { %4923 = vmatmul.mubr.msk.f32.gmra.mrb[24].mxu1 %vm316_vm0, %v6028_v25  ;;  %5149 = vmatmul.mubr.msk.f32.gmra.mrb[8].mxu0 %vm316_vm0, %v5759_v20  ;;  %v6774_v20 = vld [vmem:[#allocation9_spill] sm:$0xff] }
  0xcd   : > { %4925 = vmatprep.mubr.msk.f32.mxu1 %vm316_vm0, %v6034_v58  ;;  %5151 = vmatprep.mubr.msk.f32.mxu0 %vm316_vm0, %v5762_v21  ;;  %v6775_v21 = vld [vmem:[#allocation22_spill] sm:$0xff] }
  0xd0   : > { %4926 = vmatmul.mubr.msk.f32.gmra.mrb[26].mxu1 %vm316_vm0, %v6048_v32  ;;  %5152 = vmatmul.mubr.msk.f32.gmra.mrb[10].mxu0 %vm316_vm0, %v5773_v22  ;;  %v6776_v22 = vld [vmem:[#allocation10_spill] sm:$0xff] }
  0xd1   : > { %4928 = vmatprep.mubr.msk.f32.mxu1 %vm316_vm0, %v6054_v57  ;;  %5154 = vmatprep.mubr.msk.f32.mxu0 %vm316_vm0, %v5776_v23  ;;  %v6777_v23 = vld [vmem:[#allocation23_spill] sm:$0xff] }
  0xd4   : > { %4929 = vmatmul.mubr.msk.f32.gmra.mrb[28].mxu1 %vm316_vm0, %v6068_v56  ;;  %5155 = vmatmul.mubr.msk.f32.gmra.mrb[12].mxu0 %vm316_vm0, %v5787_v24  ;;  %v6778_v24 = vld [vmem:[#allocation11_spill] sm:$0xff] }
  0xd5   : > { %4931 = vmatprep.mubr.msk.f32.mxu1 %vm316_vm0, %v6074_v52  ;;  %5157 = vmatprep.mubr.msk.f32.mxu0 %vm316_vm0, %v4348_v9  ;;  %v6427_v9 = vld [vmem:[%s5678_s8 + $0x279] sm:$0xff] }
  0xd8   : > { %4932 = vmatmul.mubr.msk.f32.gmra.mrb[30].mxu1 %vm316_vm0, %v6088_v48  ;;  %5158 = vmatmul.mubr.msk.f32.gmra.mrb[14].mxu0 %vm316_vm0, %v4349_v12  ;;  %v4364_v12 = vld [vmem:[%s5678_s8 + $0x289] sm:$0xff] }
  0xd9   : > { %4936 = vmatprep.mubr.msk.f32.mxu1 %vm316_vm0, %v5965_v62  ;;  %5160 = vmatprep.mubr.msk.f32.mxu0 %vm316_vm0, %v5829_v34  ;;  %v6781_v62 = vld [vmem:[#allocation25_spill] sm:$0xff] }
  0xdc   : > { %4937 = vmatmul.mubr.msk.f32.vlgmr.msra.gmra.mrb[0].mxu1 %vm316_vm0, %v6766_v13  ;;  %5161 = vmatmul.mubr.msk.f32.gmra.mrb[16].mxu0 %vm316_vm0, %v6767_v14  ;;  %v6788_v13 = vld [vmem:[#allocation30_spill] sm:$0xff] }
  0xdd   : > { %5294 = vmatpush3.msra.mxu1 %v5664_v2  ;;  %4939 = vmatprep.mubr.msk.f32.mxu1 %vm316_vm0, %v5990_v4  ;;  %v6773_v2 = vld [vmem:[#allocation21_spill] sm:$0xff]  ;;  %v6783_v4 = vld [vmem:[#allocation26_spill] sm:$0xff] }
  0xde   : > { %5163 = vmatprep.mubr.msk.f32.mxu0 %vm316_vm0, %v6768_v15 }
  0xe0   : > { %4940 = vmatmul.mubr.msk.f32.gmra.mrb[2].mxu1 %vm316_vm0, %v6769_v16  ;;  %5164 = vmatmul.mubr.msk.f32.gmra.mrb[18].mxu0 %vm316_vm0, %v6770_v17  ;;  %v6789_v16 = vld [vmem:[#allocation34_spill] sm:$0xff] }
  0xe1   : > { %4942 = vmatprep.mubr.msk.f32.mxu1 %vm316_vm0, %v6771_v18  ;;  %5166 = vmatprep.mubr.msk.f32.mxu0 %vm316_vm0, %v6772_v19  ;;  %v4365_v18 = vld [vmem:[%s5678_s8 + $0x291] sm:$0xff] }
  0xe4   : > { %4943 = vmatmul.mubr.msk.f32.gmra.mrb[4].mxu1 %vm316_vm0, %v6773_v2  ;;  %5167 = vmatmul.mubr.msk.f32.gmra.mrb[20].mxu0 %vm316_vm0, %v6774_v20  ;;  %v6790_v2 = vld [vmem:[#allocation35_spill] sm:$0xff] }
  0xe5   : > { %4945 = vmatprep.mubr.msk.f32.mxu1 %vm316_vm0, %v6775_v21  ;;  %5169 = vmatprep.mubr.msk.f32.mxu0 %vm316_vm0, %v6776_v22  ;;  %v6791_v21 = vld [vmem:[#allocation32_spill] sm:$0xff] }
  0xe8   : > { %4946 = vmatmul.mubr.msk.f32.gmra.mrb[6].mxu1 %vm316_vm0, %v6777_v23  ;;  %5170 = vmatmul.mubr.msk.f32.gmra.mrb[22].mxu0 %vm316_vm0, %v6778_v24  ;;  %v6792_v23 = vld [vmem:[#allocation33_spill] sm:$0xff] }
  0xe9   : > { %4948 = vmatprep.mubr.msk.f32.mxu1 %vm316_vm0, %v6779_v59  ;;  %5172 = vmatprep.mubr.msk.f32.mxu0 %vm316_vm0, %v6780_v61 }
  0xec   : > { %4949 = vmatmul.mubr.msk.f32.gmra.mrb[8].mxu1 %vm316_vm0, %v6781_v62  ;;  %5173 = vmatmul.mubr.msk.f32.gmra.mrb[24].mxu0 %vm316_vm0, %v6782_v1 }
  0xed   : > { %4951 = vmatprep.mubr.msk.f32.mxu1 %vm316_vm0, %v6783_v4  ;;  %5175 = vmatprep.mubr.msk.f32.mxu0 %vm316_vm0, %v6784_v8 }
  0xf0   : > { %4952 = vmatmul.mubr.msk.f32.gmra.mrb[10].mxu1 %vm316_vm0, %v6785_v50  ;;  %5176 = vmatmul.mubr.msk.f32.gmra.mrb[26].mxu0 %vm316_vm0, %v6786_v0 }
  0xf1   : > { %4954 = vmatprep.mubr.msk.f32.mxu1 %vm316_vm0, %v6787_v6  ;;  %5178 = vmatprep.mubr.msk.f32.mxu0 %vm316_vm0, %v6416_v42 }
  0xf4   : > { %4955 = vmatmul.mubr.msk.f32.gmra.mrb[12].mxu1 %vm316_vm0, %v6788_v13  ;;  %5179 = vmatmul.mubr.msk.f32.gmra.mrb[28].mxu0 %vm316_vm0, %v6427_v9 }
  0xf5   : > { %4957 = vmatprep.mubr.msk.f32.mxu1 %vm316_vm0, %v6789_v16  ;;  %5181 = vmatprep.mubr.msk.f32.mxu0 %vm316_vm0, %v4364_v12 }
  0xf8   : > { %4958 = vmatmul.mubr.msk.f32.gmra.mrb[14].mxu1 %vm316_vm0, %v6790_v2  ;;  %5182 = vmatmul.mubr.msk.f32.gmra.mrb[30].mxu0 %vm316_vm0, %v4365_v18 }
  0xf9   : > { %4960 = vmatprep.mubr.msk.f32.mxu1 %vm316_vm0, %v6791_v21  ;;  %5186 = vmatprep.mubr.msk.f32.mxu0 %vm316_vm0, %v5808_v30  ;;  %v4413_v30 = vld [vmem:[%s5678_s8 + $0xda] sm:$0xff] }
  0xfc   : > { %4961 = vmatmul.mubr.msk.f32.gmra.mrb[16].mxu1 %vm316_vm0, %v6792_v23  ;;  %5187 = vmatmul.mubr.msk.f32.vlgmr.msra.gmra.mrb[0].mxu0 %vm316_vm0, %v5824_v33  ;;  %v6794_v33 = vld [vmem:[#allocation17_spill] sm:$0xff] }
  0xfd   : > { %4963 = vmatprep.mubr.msk.f32.mxu1 %vm316_vm0, %v6139_v40  ;;  %5189 = vmatprep.mubr.msk.f32.mxu0 %vm316_vm0, %v5832_v35  ;;  %v4414_v35 = vld [vmem:[%s5678_s8 + $0xe2] sm:$0xff] }
  0xfe   : > { %v6798_v40 = vld [vmem:[#allocation31_spill] sm:$0xff] }
 0x100   : > { %4964 = vmatmul.mubr.msk.f32.gmra.mrb[18].mxu1 %vm316_vm0, %v6151_v31  ;;  %5190 = vmatmul.mubr.msk.f32.gmra.mrb[2].mxu0 %vm316_vm0, %v5847_v37  ;;  %v6795_v37 = vld [vmem:[#allocation3_spill] sm:$0xff] }
 0x101   : > { %4966 = vmatprep.mubr.msk.f32.mxu1 %vm316_vm0, %v6154_v36  ;;  %5192 = vmatprep.mubr.msk.f32.mxu0 %vm316_vm0, %v5853_v39  ;;  %v6796_v39 = vld [vmem:[#allocation4_spill] sm:$0xff] }
 0x104   : > { %4967 = vmatmul.mubr.msk.f32.gmra.mrb[20].mxu1 %vm316_vm0, %v6165_v38  ;;  %5193 = vmatmul.mubr.msk.f32.gmra.mrb[4].mxu0 %vm316_vm0, %v5867_v41  ;;  %v4430_v41 = vld [vmem:[%s5678_s8 + $0x292] sm:$0xff] }
 0x105   : > { %4969 = vmatprep.mubr.msk.f32.mxu1 %vm316_vm0, %v6168_v44  ;;  %5195 = vmatprep.mubr.msk.f32.mxu0 %vm316_vm0, %v5873_v43 }
 0x108   : > { %4970 = vmatmul.mubr.msk.f32.gmra.mrb[22].mxu1 %vm316_vm0, %v6179_v29  ;;  %5196 = vmatmul.mubr.msk.f32.gmra.mrb[6].mxu0 %vm316_vm0, %v5887_v45  ;;  %v6793_v29 = vld [vmem:[#allocation15_spill] sm:$0xff] }
 0x109   : > { %4972 = vmatprep.mubr.msk.f32.mxu1 %vm316_vm0, %v6182_v60  ;;  %5198 = vmatprep.mubr.msk.f32.mxu0 %vm316_vm0, %v5893_v47 }
 0x10c   : > { %4973 = vmatmul.mubr.msk.f32.gmra.mrb[24].mxu1 %vm316_vm0, %v6193_v54  ;;  %5199 = vmatmul.mubr.msk.f32.gmra.mrb[8].mxu0 %vm316_vm0, %v5907_v49 }
 0x10d   : > { %4975 = vmatprep.mubr.msk.f32.mxu1 %vm316_vm0, %v6196_v55  ;;  %5201 = vmatprep.mubr.msk.f32.mxu0 %vm316_vm0, %v5913_v51 }
 0x110   : > { %4976 = vmatmul.mubr.msk.f32.gmra.mrb[26].mxu1 %vm316_vm0, %v6210_v46  ;;  %5202 = vmatmul.mubr.msk.f32.gmra.mrb[10].mxu0 %vm316_vm0, %v5927_v53 }
 0x111   : > { %4978 = vmatprep.mubr.msk.f32.mxu1 %vm316_vm0, %v6216_v11  ;;  %5204 = vmatprep.mubr.msk.f32.mxu0 %vm316_vm0, %v6793_v29 }
 0x114   : > { %4979 = vmatmul.mubr.msk.f32.gmra.mrb[28].mxu1 %vm316_vm0, %v6227_v27  ;;  %5205 = vmatmul.mubr.msk.f32.gmra.mrb[12].mxu0 %vm316_vm0, %v6794_v33 }
 0x115   : > { %4981 = vmatprep.mubr.msk.f32.mxu1 %vm316_vm0, %v6280_v26  ;;  %5207 = vmatprep.mubr.msk.f32.mxu0 %vm316_vm0, %v4413_v30 }
 0x118   : > { %4982 = vmatmul.mubr.msk.f32.gmra.mrb[30].mxu1 %vm316_vm0, %v6291_v28  ;;  %5208 = vmatmul.mubr.msk.f32.gmra.mrb[14].mxu0 %vm316_vm0, %v4414_v35 }
 0x119   : > { %5010 = vmatprep.mubr.msk.f32.mxu1 %vm316_vm0, %v6795_v37  ;;  %5210 = vmatprep.mubr.msk.f32.mxu0 %vm316_vm0, %v5968_v63 }
 0x11c   : > { %5011 = vmatmul.mubr.msk.f32.vlgmr.msra.gmra.mrb[16].mxu1 %vm316_vm0, %v6796_v39  ;;  %5211 = vmatmul.mubr.msk.f32.gmra.mrb[16].mxu0 %vm316_vm0, %v5985_v3 }
 0x11d   : > { %5013 = vmatprep.mubr.msk.f32.mxu1 %vm316_vm0, %v5829_v34  ;;  %5213 = vmatprep.mubr.msk.f32.mxu0 %vm316_vm0, %v5993_v5  ;;  %v4429_v34 = vld [vmem:[%s5678_s8 + $0x28a] sm:$0xff]  ;;  %v6578_v5 = vld [vmem:[%s6685_s2] ss:$0 sm:$0xff] }
 0x120   : > { %5014 = vmatmul.mubr.msk.f32.gmra.mrb[18].mxu1 %vm316_vm0, %v6767_v14  ;;  %5214 = vmatmul.mubr.msk.f32.gmra.mrb[18].mxu0 %vm316_vm0, %v6008_v7 }
 0x121   : > { %5016 = vmatprep.mubr.msk.f32.mxu1 %vm316_vm0, %v6768_v15  ;;  %5216 = vmatprep.mubr.msk.f32.mxu0 %vm316_vm0, %v6014_v10 }
 0x124   : > { %5017 = vmatmul.mubr.msk.f32.gmra.mrb[20].mxu1 %vm316_vm0, %v6770_v17  ;;  %5217 = vmatmul.mubr.msk.f32.gmra.mrb[20].mxu0 %vm316_vm0, %v6028_v25 }
 0x125   : > { %5019 = vmatprep.mubr.msk.f32.mxu1 %vm316_vm0, %v6772_v19  ;;  %5219 = vmatprep.mubr.msk.f32.mxu0 %vm316_vm0, %v6034_v58 }
 0x128   : > { %5020 = vmatmul.mubr.msk.f32.gmra.mrb[22].mxu1 %vm316_vm0, %v6774_v20  ;;  %5220 = vmatmul.mubr.msk.f32.gmra.mrb[22].mxu0 %vm316_vm0, %v6048_v32  ;;  %v6797_v32 = vld [vmem:[#allocation29_spill] sm:$0xff] }
 0x129   : > { %5022 = vmatprep.mubr.msk.f32.mxu1 %vm316_vm0, %v6776_v22  ;;  %5222 = vmatprep.mubr.msk.f32.mxu0 %vm316_vm0, %v6054_v57 }
 0x12c   : > { %5023 = vmatmul.mubr.msk.f32.gmra.mrb[24].mxu1 %vm316_vm0, %v6778_v24  ;;  %5223 = vmatmul.mubr.msk.f32.gmra.mrb[24].mxu0 %vm316_vm0, %v6068_v56 }
 0x12d   : > { %5025 = vmatprep.mubr.msk.f32.mxu1 %vm316_vm0, %v6780_v61  ;;  %5225 = vmatprep.mubr.msk.f32.mxu0 %vm316_vm0, %v6074_v52 }
 0x130   : > { %5026 = vmatmul.mubr.msk.f32.gmra.mrb[26].mxu1 %vm316_vm0, %v6782_v1  ;;  %5226 = vmatmul.mubr.msk.f32.gmra.mrb[26].mxu0 %vm316_vm0, %v6088_v48 }
 0x131   : > { %5028 = vmatprep.mubr.msk.f32.mxu1 %vm316_vm0, %v6784_v8  ;;  %5228 = vmatprep.mubr.msk.f32.mxu0 %vm316_vm0, %v6797_v32 }
 0x134   : > { %5029 = vmatmul.mubr.msk.f32.gmra.mrb[28].mxu1 %vm316_vm0, %v6786_v0  ;;  %5229 = vmatmul.mubr.msk.f32.gmra.mrb[28].mxu0 %vm316_vm0, %v6798_v40 }
 0x135   : > { %5031 = vmatprep.mubr.msk.f32.mxu1 %vm316_vm0, %v6416_v42  ;;  %5231 = vmatprep.mubr.msk.f32.mxu0 %vm316_vm0, %v4429_v34 }
 0x138   : > { %5032 = vmatmul.mubr.msk.f32.gmra.mrb[30].mxu1 %vm316_vm0, %v6427_v9  ;;  %5232 = vmatmul.mubr.msk.f32.gmra.mrb[30].mxu0 %vm316_vm0, %v4430_v41 }
 0x1af   : > { %v4938_v43 = vpop.f32.mrb[0].mxu1 }
 0x1b0   : > { %v1545_v44 = vpop.f32.mrb[1].mxu1 }
 0x1b3   : > { %v4941_v45 = vpop.f32.mrb[2].mxu1 }
 0x1b4   : > { %v1555_v46 = vpop.f32.mrb[3].mxu1 }
 0x1b7   : > { %v4944_v47 = vpop.f32.mrb[4].mxu1 }
 0x1b8   : > { %v1565_v48 = vpop.f32.mrb[5].mxu1 }
 0x1bb   : > { %v4947_v49 = vpop.f32.mrb[6].mxu1 }
 0x1bc   : > { %v1575_v51 = vpop.f32.mrb[7].mxu1 }
 0x1bf   : > { %v4950_v52 = vpop.f32.mrb[8].mxu1 }
 0x1c0   : > { %v1585_v53 = vpop.f32.mrb[9].mxu1 }
 0x1c3   : > { %v4953_v54 = vpop.f32.mrb[10].mxu1 }
 0x1c4   : > { %v1595_v55 = vpop.f32.mrb[11].mxu1 }
 0x1c7   : > { %v4956_v56 = vpop.f32.mrb[12].mxu1 }
 0x1c8   : > { %v6569_v57 = vpop.f32.mrb[13].mxu1 }
 0x1cb   : > { %v6571_v63 = vpop.f32.mrb[14].mxu1 }
 0x1cc   : > { %v6573_v3 = vpop.f32.mrb[15].mxu1 }
 0x1cf   : > { %v5188_v7 = vpop.f32.mrb[0].mxu0 }
 0x1d0   : > { %v5295_v10 = vadd.f32 %v5188_v7, %v4938_v43  ;;  %v3483_v11 = vpop.f32.mrb[1].mxu0 }
 0x1d1   : > { %v5296_v25 = vadd.f32 %v3483_v11, %v1545_v44 }
 0x1d2   : > { %v3681_v27 = vadd.f32 %v5295_v10, %v6578_v5 }
 0x1d3   : > { %v3680_v58 = vadd.f32 %v5296_v25, %v6578_v5  ;;  %v5191_v60 = vpop.f32.mrb[2].mxu0 }
 0x1d4   : > { %v3713_v38 = vmax.f32 %v3681_v27, 0.0  ;;  %v5297_v31 = vadd.f32 %v5191_v60, %v4941_v45  ;;  %v3493_v36 = vpop.f32.mrb[3].mxu0 }
 0x1d5   : > { %v3712_v26 = vmax.f32 %v3680_v58, 0.0  ;;  %v5298_v28 = vadd.f32 %v3493_v36, %v1555_v46 }
 0x1d6   : > { %v3683_v15 = vadd.f32 %v5297_v31, %v6578_v5 }
 0x1d7   : > { %v3745_v14 = vadd.f32 %v3713_v38, %v3712_v26  ;;  %v3682_v17 = vadd.f32 %v5298_v28, %v6578_v5  ;;  %v5194_v19 = vpop.f32.mrb[4].mxu0 }
 0x1d8   : > { %v5299_v20 = vadd.f32 %v5194_v19, %v4944_v47  ;;  %v3503_v22 = vpop.f32.mrb[5].mxu0  ;;  %v3715_v61 = vmax.f32 %v3683_v15, 0.0 }
 0x1d9   : > { %v3714_v24 = vmax.f32 %v3682_v17, 0.0  ;;  %v5300_v59 = vadd.f32 %v3503_v22, %v1565_v48 }
 0x1da   : > { %v3685_v1 = vadd.f32 %v5299_v20, %v6578_v5 }
 0x1db   : > { %v3746_v62 = vadd.f32 %v3745_v14, %v3714_v24  ;;  %v3684_v4 = vadd.f32 %v5300_v59, %v6578_v5  ;;  %v5197_v8 = vpop.f32.mrb[6].mxu0 }
 0x1dc   : > { %v5301_v42 = vadd.f32 %v5197_v8, %v4947_v49  ;;  %v3513_v50 = vpop.f32.mrb[7].mxu0  ;;  %v3717_v12 = vmax.f32 %v3685_v1, 0.0 }
 0x1dd   : > { %v3716_v0 = vmax.f32 %v3684_v4, 0.0  ;;  %v3747_v6 = vadd.f32 %v3746_v62, %v3715_v61  ;;  %v5302_v9 = vadd.f32 %v3513_v50, %v1575_v51 }
 0x1de   : > { %v3687_v16 = vadd.f32 %v5301_v42, %v6578_v5 }
 0x1df   : > { %v3748_v13 = vadd.f32 %v3747_v6, %v3716_v0  ;;  %v3686_v18 = vadd.f32 %v5302_v9, %v6578_v5  ;;  %v5200_v2 = vpop.f32.mrb[8].mxu0 }
 0x1e0   : > { %v5303_v21 = vadd.f32 %v5200_v2, %v4950_v52  ;;  %v3523_v23 = vpop.f32.mrb[9].mxu0  ;;  %v3719_v35 = vmax.f32 %v3687_v16, 0.0 }
 0x1e1   : > { %v3718_v29 = vmax.f32 %v3686_v18, 0.0  ;;  %v3749_v30 = vadd.f32 %v3748_v13, %v3717_v12  ;;  %v5304_v33 = vadd.f32 %v3523_v23, %v1585_v53 }
 0x1e2   : > { %v3689_v39 = vadd.f32 %v5303_v21, %v6578_v5 }
 0x1e3   : > { %v3750_v37 = vadd.f32 %v3749_v30, %v3718_v29  ;;  %v3688_v32 = vadd.f32 %v5304_v33, %v6578_v5  ;;  %v5203_v34 = vpop.f32.mrb[10].mxu0 }
 0x1e4   : > { %v5305_v40 = vadd.f32 %v5203_v34, %v4953_v54  ;;  %v3533_v41 = vpop.f32.mrb[11].mxu0  ;;  %v3721_v46 = vmax.f32 %v3689_v39, 0.0 }
 0x1e5   : > { %v3720_v43 = vmax.f32 %v3688_v32, 0.0  ;;  %v3751_v44 = vadd.f32 %v3750_v37, %v3719_v35  ;;  %v5306_v45 = vadd.f32 %v3533_v41, %v1595_v55 }
 0x1e6   : > { %v3691_v48 = vadd.f32 %v5305_v40, %v6578_v5 }
 0x1e7   : > { %v3752_v47 = vadd.f32 %v3751_v44, %v3720_v43  ;;  %v3690_v49 = vadd.f32 %v5306_v45, %v6578_v5  ;;  %v5206_v51 = vpop.f32.mrb[12].mxu0 }
 0x1e8   : > { %v5307_v52 = vadd.f32 %v5206_v51, %v4956_v56  ;;  %v3543_v53 = vpop.f32.mrb[13].mxu0  ;;  %v3723_v25 = vmax.f32 %v3691_v48, 0.0 }
 0x1e9   : > { %v3722_v7 = vmax.f32 %v3690_v49, 0.0  ;;  %v3753_v10 = vadd.f32 %v3752_v47, %v3721_v46  ;;  %v5308_v11 = vadd.f32 %v3543_v53, %v6569_v57 }
 0x1ea   : > { %v3693_v54 = vadd.f32 %v5307_v52, %v6578_v5 }
 0x1eb   : > { %v3754_v27 = vadd.f32 %v3753_v10, %v3722_v7  ;;  %v3692_v58 = vadd.f32 %v5308_v11, %v6578_v5  ;;  %v5209_v55 = vpop.f32.mrb[14].mxu0 }
 0x1ec   : > { %v5309_v60 = vadd.f32 %v5209_v55, %v6571_v63  ;;  %v3553_v38 = vpop.f32.mrb[15].mxu0  ;;  %v3725_v56 = vmax.f32 %v3693_v54, 0.0 }
 0x1ed   : > { %v3724_v31 = vmax.f32 %v3692_v58, 0.0  ;;  %v3755_v36 = vadd.f32 %v3754_v27, %v3723_v25  ;;  %v5310_v26 = vadd.f32 %v3553_v38, %v6573_v3 }
 0x1ee   : > { %v3695_v14 = vadd.f32 %v5309_v60, %v6578_v5 }
 0x1ef   : > { %v3756_v28 = vadd.f32 %v3755_v36, %v3724_v31  ;;  %v3694_v57 = vadd.f32 %v5310_v26, %v6578_v5  ;;  %v5012_v15 = vpop.f32.mrb[16].mxu1  ;;  %v5212_v17 = vpop.f32.mrb[16].mxu0 }
 0x1f0   : > { %v5311_v19 = vadd.f32 %v5212_v17, %v5012_v15  ;;  %v2012_v20 = vpop.f32.mrb[17].mxu1  ;;  %v3563_v22 = vpop.f32.mrb[17].mxu0  ;;  %v3727_v62 = vmax.f32 %v3695_v14, 0.0 }
 0x1f1   : > { %v3726_v24 = vmax.f32 %v3694_v57, 0.0  ;;  %v3757_v59 = vadd.f32 %v3756_v28, %v3725_v56  ;;  %v5312_v61 = vadd.f32 %v3563_v22, %v2012_v20 }
 0x1f2   : > { %v3697_v63 = vadd.f32 %v5311_v19, %v6578_v5 }
 0x1f3   : > { %v3758_v1 = vadd.f32 %v3757_v59, %v3726_v24  ;;  %v3696_v3 = vadd.f32 %v5312_v61, %v6578_v5  ;;  %v5015_v4 = vpop.f32.mrb[18].mxu1  ;;  %v5215_v8 = vpop.f32.mrb[18].mxu0 }
 0x1f4   : > { %v3729_v42 = vmax.f32 %v3697_v63, 0.0  ;;  %v5313_v50 = vadd.f32 %v5215_v8, %v5015_v4  ;;  %v2022_v0 = vpop.f32.mrb[19].mxu1  ;;  %v3573_v6 = vpop.f32.mrb[19].mxu0 }
 0x1f5   : > { %v6601_v9 = vadd.f32 %v3758_v1, %v3727_v62  ;;  %v3728_v12 = vmax.f32 %v3696_v3, 0.0  ;;  %v5314_v13 = vadd.f32 %v3573_v6, %v2022_v0 }
 0x1f6   : > { %v3699_v18 = vadd.f32 %v5313_v50, %v6578_v5 }
 0x1f7   : > { %v3766_v16 = vadd.f32 %v3729_v42, %v3728_v12  ;;  %v3698_v2 = vadd.f32 %v5314_v13, %v6578_v5  ;;  %v5018_v21 = vpop.f32.mrb[20].mxu1  ;;  %v5218_v23 = vpop.f32.mrb[20].mxu0 }
 0x1f8   : > { %v5315_v29 = vadd.f32 %v5218_v23, %v5018_v21  ;;  %v2032_v30 = vpop.f32.mrb[21].mxu1  ;;  %v3583_v33 = vpop.f32.mrb[21].mxu0  ;;  %v3731_v39 = vmax.f32 %v3699_v18, 0.0 }
 0x1f9   : > { %v3730_v35 = vmax.f32 %v3698_v2, 0.0  ;;  %v5316_v37 = vadd.f32 %v3583_v33, %v2032_v30 }
 0x1fa   : > { %v3701_v34 = vadd.f32 %v5315_v29, %v6578_v5  ;;  %v3760_v29 = vrot.slane %v6601_v9, 4 }
 0x1fb   : > { %v3767_v32 = vadd.f32 %v3766_v16, %v3730_v35  ;;  %v3700_v40 = vadd.f32 %v5316_v37, %v6578_v5  ;;  %v5021_v41 = vpop.f32.mrb[22].mxu1  ;;  %v5221_v43 = vpop.f32.mrb[22].mxu0 }
 0x1fc   : > { %v5317_v44 = vadd.f32 %v5221_v43, %v5021_v41  ;;  %v2042_v45 = vpop.f32.mrb[23].mxu1  ;;  %v3593_v46 = vpop.f32.mrb[23].mxu0  ;;  %v3733_v51 = vmax.f32 %v3701_v34, 0.0 }
 0x1fd   : > { %v3732_v47 = vmax.f32 %v3700_v40, 0.0  ;;  %v3768_v48 = vadd.f32 %v3767_v32, %v3731_v39  ;;  %v5318_v49 = vadd.f32 %v3593_v46, %v2042_v45  ;;  %v3761_v40 = vadd.f32 %v3760_v29, %v6601_v9  ;;  %v3799_v9 = vld [vmem:[%s6686_s3] sm:$0xff] (!%p4465_p5) }
 0x1fe   : > { %v3703_v53 = vadd.f32 %v5317_v44, %v6578_v5 }
 0x1ff   : > { %v3769_v52 = vadd.f32 %v3768_v48, %v3732_v47  ;;  %v3702_v7 = vadd.f32 %v5318_v49, %v6578_v5  ;;  %v5024_v10 = vpop.f32.mrb[24].mxu1  ;;  %v5224_v11 = vpop.f32.mrb[24].mxu0  ;;  %v3762_v46 = vrot.slane %v3761_v40, 2 }
 0x200   : > { %v5319_v25 = vadd.f32 %v5224_v11, %v5024_v10  ;;  %v2052_v27 = vpop.f32.mrb[25].mxu1  ;;  %v3603_v54 = vpop.f32.mrb[25].mxu0  ;;  %v3735_v38 = vmax.f32 %v3703_v53, 0.0 }
 0x201   : > { %v3734_v58 = vmax.f32 %v3702_v7, 0.0  ;;  %v3770_v55 = vadd.f32 %v3769_v52, %v3733_v51  ;;  %v5320_v60 = vadd.f32 %v3603_v54, %v2052_v27  ;;  %v3763_v49 = vadd.f32 %v3762_v46, %v3761_v40 }
 0x202   : > { %v3705_v36 = vadd.f32 %v5319_v25, %v6578_v5  ;;  %v3744_v25 = vld [vmem:[#allocation2] sm:$0x3] }
 0x203   : > { %v3771_v31 = vadd.f32 %v3770_v55, %v3734_v58  ;;  %v3704_v26 = vadd.f32 %v5320_v60, %v6578_v5  ;;  %v5027_v56 = vpop.f32.mrb[26].mxu1  ;;  %v5227_v28 = vpop.f32.mrb[26].mxu0  ;;  %v3764_v53 = vrot.slane %v3763_v49, 1  ;;  %v3800_v58 = vld [vmem:[%s6686_s3 + $0x8] sm:$0xff] (!%p4465_p5)  ;;  %v3801_v55 = vld [vmem:[%s6686_s3 + $0x10] sm:$0xff] (!%p4465_p5)  ;;  %v5604_v60 = vmov (!%p4465_p5), 0.0|0.0  }
 0x204   : > { %v5321_v14 = vadd.f32 %v5227_v28, %v5027_v56  ;;  %v2062_v57 = vpop.f32.mrb[27].mxu1  ;;  %v3613_v15 = vpop.f32.mrb[27].mxu0  ;;  %v3737_v22 = vmax.f32 %v3705_v36, 0.0  ;;  %5269 = vmatprep.subr.bf16.mxu0 (!%p4465_p5), %v5604_v60  ;;  %v5606_v36 = vmov (!%p4465_p5), 0.0   ;;  %v3803_v56 = vld [vmem:[%s6686_s3 + $0x20] sm:$0xff] (!%p4465_p5)  ;;  %v3804_v28 = vld [vmem:[%s6686_s3 + $0x28] sm:$0xff] (!%p4465_p5) }
 0x205   : > { %v3736_v17 = vmax.f32 %v3704_v26, 0.0  ;;  %v3772_v19 = vadd.f32 %v3771_v31, %v3735_v38  ;;  %v5322_v20 = vadd.f32 %v3613_v15, %v2062_v57  ;;  %v3765_v11 = vadd.f32 %v3764_v53, %v3763_v49  ;;  %v3802_v31 = vld [vmem:[%s6686_s3 + $0x18] sm:$0xff] (!%p4465_p5)  ;;  %5266 = vmatprep.mubr.msk.f32.mxu0 (!%p4465_p5), %vm5605_vm2, %v5606_v36  ;;  %v3805_v57 = vld [vmem:[%s6686_s3 + $0x30] sm:$0xff] (!%p4465_p5) }
 0x206   : > { %v3707_v59 = vadd.f32 %v5321_v14, %v6578_v5  ;;  %v5270_v38 = vpack.c.bf16 (!%p4465_p5), %v3800_v58, %v3799_v9  ;;  %v5273_v26 = vpack.c.bf16 (!%p4465_p5), %v3802_v31, %v3801_v55  ;;  %v5276_v14 = vpack.c.bf16 (!%p4465_p5), %v3804_v28, %v3803_v56  ;;  %v3806_v15 = vld [vmem:[%s6686_s3 + $0x38] sm:$0xff] (!%p4465_p5) }
 0x207   : > { %v3773_v24 = vadd.f32 %v3772_v19, %v3736_v17  ;;  %v3706_v61 = vadd.f32 %v5322_v20, %v6578_v5  ;;  %v5030_v63 = vpop.f32.mrb[28].mxu1  ;;  %v5230_v62 = vpop.f32.mrb[28].mxu0  ;;  %v5279_v17 = vpack.c.bf16 (!%p4465_p5), %v3806_v15, %v3805_v57  ;;  %v3807_v19 = vld [vmem:[%s6686_s3 + $0x40] sm:$0xff] (!%p4465_p5)  ;;  %v3808_v20 = vld [vmem:[%s6686_s3 + $0x48] sm:$0xff] (!%p4465_p5) }
 0x208   : > { %v5323_v1 = vadd.f32 %v5230_v62, %v5030_v63  ;;  %v2072_v3 = vpop.f32.mrb[29].mxu1  ;;  %v3623_v4 = vpop.f32.mrb[29].mxu0  ;;  %v3739_v0 = vmax.f32 %v3707_v59, 0.0  ;;  %5271 = vmatpush3.bf16.msra.mxu0 (!%p4465_p5), %v5270_v38  ;;  %v3810_v59 = vld [vmem:[%s6686_s3 + $0x58] sm:$0xff] (!%p4465_p5)  ;;  %v3811_v63 = vld [vmem:[%s6686_s3 + $0x60] sm:$0xff] (!%p4465_p5)  ;;  %v3812_v62 = vld [vmem:[%s6686_s3 + $0x68] sm:$0xff] (!%p4465_p5) }
 0x209   : > { %v3738_v8 = vmax.f32 %v3706_v61, 0.0  ;;  %v3774_v42 = vadd.f32 %v3773_v24, %v3737_v22  ;;  %v5324_v50 = vadd.f32 %v3623_v4, %v2072_v3  ;;  %5272 = vmatprep.subr.bf16.mxu0 (!%p4465_p5), %v5604_v60  ;;  %v5282_v22 = vpack.c.bf16 (!%p4465_p5), %v3808_v20, %v3807_v19  ;;  %v3809_v24 = vld [vmem:[%s6686_s3 + $0x50] sm:$0xff] (!%p4465_p5)  ;;  %v3814_v4 = vld [vmem:[%s6686_s3 + $0x78] sm:$0xff] (!%p4465_p5) }
 0x20a   : > { %v3709_v12 = vadd.f32 %v5323_v1, %v6578_v5  ;;  %v5285_v61 = vpack.c.bf16 (!%p4465_p5), %v3810_v59, %v3809_v24  ;;  %v5288_v1 = vpack.c.bf16 (!%p4465_p5), %v3812_v62, %v3811_v63  ;;  %v3813_v3 = vld [vmem:[%s6686_s3 + $0x70] sm:$0xff] (!%p4465_p5) }
 0x20b   : > { %v3775_v6 = vadd.f32 %v3774_v42, %v3738_v8  ;;  %v3708_v13 = vadd.f32 %v5324_v50, %v6578_v5  ;;  %v5033_v16 = vpop.f32.mrb[30].mxu1  ;;  %v5233_v18 = vpop.f32.mrb[30].mxu0  ;;  %v5291_v8 = vpack.c.bf16 (!%p4465_p5), %v3814_v4, %v3813_v3  ;;  %v4466_v50 = vld [vmem:[%s6687_s4] ss:$0 sm:$0xff] (!%p4465_p5) }
 0x20c   : > { %v5325_v2 = vadd.f32 %v5233_v18, %v5033_v16  ;;  %v2082_v21 = vpop.f32.mrb[31].mxu1  ;;  %v3633_v23 = vpop.f32.mrb[31].mxu0  ;;  %v3741_v37 = vmax.f32 %v3709_v12, 0.0  ;;  %5274 = vmatpush3.bf16.msra.mxu0 (!%p4465_p5), %v5273_v26 }
 0x20d   : > { %v3740_v30 = vmax.f32 %v3708_v13, 0.0  ;;  %v3776_v33 = vadd.f32 %v3775_v6, %v3739_v0  ;;  %v5326_v35 = vadd.f32 %v3633_v23, %v2082_v21  ;;  %5275 = vmatprep.subr.bf16.mxu0 (!%p4465_p5), %v5604_v60 }
 0x20e   : > { %v3711_v32 = vadd.f32 %v5325_v2, %v6578_v5 }
 0x20f   : > { %v3777_v39 = vadd.f32 %v3776_v33, %v3740_v30  ;;  %v3710_v34 = vadd.f32 %v5326_v35, %v6578_v5 }
 0x210   : > { %v3743_v44 = vmax.f32 %v3711_v32, 0.0  ;;  %5277 = vmatpush3.bf16.msra.mxu0 (!%p4465_p5), %v5276_v14 }
 0x211   : > { %v3742_v41 = vmax.f32 %v3710_v34, 0.0  ;;  %v3778_v43 = vadd.f32 %v3777_v39, %v3741_v37  ;;  %5278 = vmatprep.subr.bf16.mxu0 (!%p4465_p5), %v5604_v60 }
 0x213   : > { %v3779_v45 = vadd.f32 %v3778_v43, %v3742_v41 }
 0x214   : > { %5280 = vmatpush3.bf16.msra.mxu0 (!%p4465_p5), %v5279_v17 }
 0x215   : > { %v3780_v47 = vadd.f32 %v3779_v45, %v3743_v44  ;;  %5281 = vmatprep.subr.bf16.mxu0 (!%p4465_p5), %v5604_v60 }
 0x217   : > { %v3781_v48 = vrot.slane %v3780_v47, 4 }
 0x218   : > { %5283 = vmatpush3.bf16.msra.mxu0 (!%p4465_p5), %v5282_v22 }
 0x219   : > { %v3782_v51 = vadd.f32 %v3781_v48, %v3780_v47  ;;  %5284 = vmatprep.subr.bf16.mxu0 (!%p4465_p5), %v5604_v60 }
 0x21b   : > { %v3783_v52 = vrot.slane %v3782_v51, 2 }
 0x21c   : > { %5286 = vmatpush3.bf16.msra.mxu0 (!%p4465_p5), %v5285_v61 }
 0x21d   : > { %v3784_v7 = vadd.f32 %v3783_v52, %v3782_v51  ;;  %5287 = vmatprep.subr.bf16.mxu0 (!%p4465_p5), %v5604_v60 }
 0x21f   : > { %v3785_v10 = vrot.slane %v3784_v7, 1 }
 0x220   : > { %3797 = sbr.rel (%p4465_p5) target bundleno = 773 (0x305), region = 48  ;;  %5289 = vmatpush3.bf16.msra.mxu0 (!%p4465_p5), %v5288_v1 }
 0x221   : > { %v3786_v27 = vadd.f32 %v3785_v10, %v3784_v7  ;;  %5290 = vmatprep.subr.bf16.mxu0 (!%p4465_p5), %v5604_v60 }
 0x223   : > { %v3790_v5 = vsel %vm3789_vm1, %v3786_v27, %v3765_v11 }
 0x224   : > { %v3792_v54 = vadd.f32 %v3790_v5, %v3744_v25  ;;  %5292 = vmatpush3.bf16.msra.mxu0 (!%p4465_p5), %v5291_v8 }
 0x226   : > { %3793 = vst [vmem:[#allocation2] sm:$0x3] %v3792_v54 }
 0x22d   : > { %v3798_v42 = vld [vmem:[#allocation2] sm:$0x3] }
 0x22e   : > { %5267 = vmatmul.mubr.f32.vlgmr.msra.gmra.mrb[0].mxu0 %v3798_v42 }
 0x301   : > { %v3888_v0 = vpop.f32.mrb[0].mxu0 }
 0x302   : > { %v3889_v6 = vadd.f32 %v4466_v50, %v3888_v0  ;;  %v5268_v12 = vpop.f32.mrb[1].mxu0 }
 0x304   : > { %3892 = vst [vmem:[%s6688_s5] sm:$0x3] %v3889_v6 }
 0x305 PF: > { %s15_s20 = sadd.s32 1, %s5601_s20   ;;  %s6799_s18 = smov %s5597_s19 }
 0x306   : > { %p12_p6 = scmp.ge.s32.totalorder %s15_s20, 4   ;;  %s6800_s19 = smov %s6802_s21 }
 0x308   :  { %14 = sbr.rel (!%p12_p6) target bundleno = 2 (0x2), region = 89 }

</bundles_post_ra>
